<compile_context>
chip_gen: v5e
topology: v5e:2x2
jax: 0.10.0
libtpu: 0.0.40
codegen_flags: <defaults>
</compile_context>

<pallas_src>
import jax
import jax.numpy as jnp
from jax import lax
from jax.experimental import pallas as pl
from jax.experimental.pallas import tpu as pltpu

K = 7     # conv kernel size
PAD = 3   # padding (kernel_size // 2)

SLAB = 8                 # channels reduced per vector step (one f32 sublane group)
LANE_CHUNK = 512         # lanes per register-resident accumulator (4 vregs/carry)
TARGET_TILE_BYTES = 8 * 1024 * 1024   # ~8 MiB channel tiles (v7x-safe; fine on v5e/v6e)


def _make_kernel(C, H, W, tc, needs_mask):
    HW = H * W
    Hp, Wp = H + 2 * PAD, W + 2 * PAD
    nfull = tc // SLAB
    rem = tc % SLAB                      # only nonzero when tc == C (single tile)
    n_chunks = -(-HW // LANE_CHUNK)

    def kernel(band_ref, bias_ref, x_ref, o_ref, sum8, max8, pad_sc):
        # band_ref : VMEM (K, 2*Wp, W) f32  -- per-kh Toeplitz band, avg (with 1/C)
        #                                      and max taps stacked on the contraction axis
        # bias_ref : SMEM (1,) f32
        # x_ref    : VMEM (tc, HW)          -- flat, lane-dense channel tile
        # o_ref    : VMEM (H, W)            -- sigmoid(conv([avg, max]))
        # sum8/max8: VMEM (8, HW) f32       -- flat running channel sum / max partials
        # pad_sc   : VMEM (Hp, 2*Wp) f32    -- zero-padded conv staging (avg | max lanes)
        ci = pl.program_id(1)
        nc = pl.num_programs(1)

        # ---- init persistent flat accumulators once per batch element ----
        @pl.when(ci == 0)
        def _():
            sum8[...] = jnp.zeros_like(sum8)
            max8[...] = jnp.full_like(max8, -jnp.inf)

        # ---- streaming channel reduction: (8 x lane-chunk) vector slabs ----
        for lc in range(n_chunks):                       # static lane tiling
            lo = lc * LANE_CHUNK
            cw = min(LANE_CHUNK, HW - lo)
            csl = pl.ds(lo, cw)

            if nfull > 0:
                def body(j, carry):
                    s, m = carry
                    row0 = pl.multiple_of(j * SLAB, SLAB)
                    slab = x_ref[pl.ds(row0, SLAB), csl].astype(jnp.float32)
                    if needs_mask:                       # only for ragged C
                        ch = (ci * tc + j * SLAB
                              + lax.broadcasted_iota(jnp.int32, (SLAB, cw), 0))
                        ok = ch < C
                        s = s + jnp.where(ok, slab, 0.0)
                        m = jnp.maximum(m, jnp.where(ok, slab, -jnp.inf))
                    else:
                        s = s + slab
                        m = jnp.maximum(m, slab)
                    return s, m

                s0 = jnp.zeros((SLAB, cw), jnp.float32)
                m0 = jnp.full((SLAB, cw), -jnp.inf, jnp.float32)
                s_acc, m_acc = lax.fori_loop(0, nfull, body, (s0, m0),
                                             unroll=max(1, min(4, nfull)))
                sum8[:, csl] = sum8[:, csl] + s_acc
                max8[:, csl] = jnp.maximum(max8[:, csl], m_acc)

            if rem > 0:  # static; only when tc == C (one tile, never masked)
                tail = x_ref[pl.ds(nfull * SLAB, rem), csl].astype(jnp.float32)
                sum8[0:rem, csl] = sum8[0:rem, csl] + tail
                max8[0:rem, csl] = jnp.maximum(max8[0:rem, csl], tail)

        # ---- finalize: pooled maps -> padded staging -> K MXU matmuls -> sigmoid ----
        @pl.when(ci == nc - 1)
        def _():
            s_tot = jnp.sum(sum8[...], axis=0, keepdims=True)   # (1, HW)
            m_tot = jnp.max(max8[...], axis=0, keepdims=True)   # (1, HW)
            sum8[0:1, :] = s_tot                                 # stage for ref slicing
            max8[0:1, :] = m_tot

            pad_sc[...] = jnp.zeros_like(pad_sc)                 # zero halo == conv padding
            for h in range(H):                                   # static; once per batch elem
                pad_sc[PAD + h:PAD + h + 1, PAD:PAD + W] = \
                    sum8[0:1, pl.ds(h * W, W)]
                pad_sc[PAD + h:PAD + h + 1, Wp + PAD:Wp + PAD + W] = \
                    max8[0:1, pl.ds(h * W, W)]

            acc = jnp.zeros((H, W), jnp.float32)
            for kh in range(K):                                  # static unroll
                acc = acc + jnp.dot(pad_sc[kh:kh + H, :], band_ref[kh],
                                    preferred_element_type=jnp.float32,
                                    precision=lax.Precision.HIGHEST)
            o_ref[...] = jax.nn.sigmoid(acc + bias_ref[0]).astype(o_ref.dtype)

    return kernel


def spatial_attention(x, weight, bias):
    """x: (B, C, H, W); weight: (1, 2, K, K); bias: (1,). Returns (B, 1, H, W)."""
    B, C, H, W = x.shape
    HW = H * W
    Hp, Wp = H + 2 * PAD, W + 2 * PAD

    # ---- weight-only preprocessing (tiny, plain JAX): Toeplitz band matrices ----
    # band2[c, kh, i, j] = weight[0, c, kh, i - j] if 0 <= i - j < K else 0
    w2 = weight.reshape(2, K, K).astype(jnp.float32)
    d = jnp.arange(Wp)[:, None] - jnp.arange(W)[None, :]            # (Wp, W)
    valid = (d >= 0) & (d < K)
    taps = w2[:, :, jnp.clip(d, 0, K - 1)]                          # (2, K, Wp, W)
    band2 = jnp.where(valid[None, None], taps, 0.0)
    band2 = band2 * jnp.array([1.0 / C, 1.0], jnp.float32)[:, None, None, None]
    band = jnp.concatenate([band2[0], band2[1]], axis=1)            # (K, 2*Wp, W)
    # TODO(synk): for W >= ~256 this dense band is O(W^2) VMEM (can exceed v7x's
    # 64 MiB near W~1024); switch the kw taps to pltpu.roll lane shifts (XLU) or
    # tile the band along W for very wide feature maps.

    b_flat = bias.reshape(1).astype(jnp.float32)

    # ---- channel tile: ~8 MiB, multiple of 8 (or == C); ragged C handled by mask ----
    plane_bytes = HW * x.dtype.itemsize
    tc = max(1, TARGET_TILE_BYTES // plane_bytes)
    if tc >= C:
        tc = C
    else:
        tc = max(SLAB, (tc // SLAB) * SLAB)
    nc = -(-C // tc)
    needs_mask = (nc * tc != C)
    assert not (needs_mask and tc % SLAB), "ragged channel tile must be slab-aligned"

    x_flat = x.reshape(B, C, HW)                     # lane-dense hot-path layout

    est = (2 * tc * HW * x.dtype.itemsize            # double-buffered input tiles
           + 2 * band.size * 4                       # resident band
           + 2 * SLAB * HW * 4 + Hp * 2 * Wp * 4     # accumulators + conv staging
           + 2 * HW * x.dtype.itemsize)              # output buffers
    vmem_limit = int(min(64 * 2**20, max(32 * 2**20, est + (4 << 20))))

    kernel = _make_kernel(C, H, W, tc, needs_mask)
    out = pl.pallas_call(
        kernel,
        out_shape=jax.ShapeDtypeStruct((B, H, W), x.dtype),
        grid=(B, nc),
        in_specs=[
            pl.BlockSpec((K, 2 * Wp, W), lambda b, c: (0, 0, 0)),      # band (resident)
            pl.BlockSpec(memory_space=pltpu.MemorySpace.SMEM),         # bias
            pl.BlockSpec((None, tc, HW), lambda b, c: (b, c, 0)),      # flat channel tile
        ],
        out_specs=pl.BlockSpec((None, H, W), lambda b, c: (b, 0, 0)),
        scratch_shapes=[
            pltpu.VMEM((SLAB, HW), jnp.float32),     # running channel sum partials (flat)
            pltpu.VMEM((SLAB, HW), jnp.float32),     # running channel max partials (flat)
            pltpu.VMEM((Hp, 2 * Wp), jnp.float32),   # zero-padded conv staging
        ],
        compiler_params=pltpu.CompilerParams(
            dimension_semantics=("parallel", "arbitrary"),
            vmem_limit_bytes=vmem_limit,
        ),
    )(band, b_flat, x_flat)
    # TODO(synk): on v7x (2 TensorCores) with B < 2, add a second "parallel" grid
    # axis over H row-bands (input block with +2*PAD halo rows) to use both cores.
    return out.reshape(B, 1, H, W)


def reference(x, weight, bias):
    avg = jnp.mean(x, axis=1, keepdims=True)
    mx = jnp.max(x, axis=1, keepdims=True)
    cat = jnp.concatenate([avg, mx], axis=1)
    out = lax.conv_general_dilated(
        cat, weight, window_strides=(1, 1), padding=((PAD, PAD), (PAD, PAD)),
        dimension_numbers=("NCHW", "OIHW", "NCHW"),
        precision=lax.Precision.HIGHEST)
    return jax.nn.sigmoid(out + bias.reshape(1, -1, 1, 1))


if __name__ == "__main__":
    key = jax.random.PRNGKey(0)
    k_w, k_b, k_x = jax.random.split(key, 3)

    # Deterministic init mimicking nn.Conv2d defaults (uniform in +-1/sqrt(fan_in)).
    fan_in = 2 * K * K
    bound = 1.0 / (fan_in ** 0.5)
    weight = jax.random.uniform(k_w, (1, 2, K, K), jnp.float32, -bound, bound)
    bias = jax.random.uniform(k_b, (1,), jnp.float32, -bound, bound)

    x = jax.random.normal(k_x, (2, 4, 16, 16), jnp.float32)

    out = jax.block_until_ready(spatial_attention(x, weight, bias))
    ref = jax.block_until_ready(reference(x, weight, bias))

    assert out.shape == (2, 1, 16, 16)
    err = float(jnp.max(jnp.abs(out - ref)))
    assert err < 1e-4, f"mismatch vs reference: {err}"

    print("KERNEL_OK")
</pallas_src>

<mosaic_0001>
module attributes {stable_mosaic.version = 11 : i64} {
  func.func @kernel(%arg0: i32, %arg1: i32, %arg2: memref<7x44x16xf32, #tpu.memory_space<vmem>>, %arg3: memref<1xf32, #tpu.memory_space<smem>>, %arg4: memref<1x4x256xf32, #tpu.memory_space<vmem>>, %arg5: memref<1x16x16xf32, #tpu.memory_space<vmem>>, %arg6: memref<8x256xf32, #tpu.memory_space<vmem>>, %arg7: memref<8x256xf32, #tpu.memory_space<vmem>>, %arg8: memref<22x44xf32, #tpu.memory_space<vmem>>) attributes {dimension_semantics = [#tpu.dimension_semantics<parallel>, #tpu.dimension_semantics<arbitrary>], iteration_bounds = array<i64: 2, 1>, scalar_prefetch = 0 : i64, scratch_operands = 3 : i64, tpu.core_type = #tpu.core_type<tc>, window_params = [{pipeline_mode = #tpu.pipeline_mode<synchronous>, transform_indices = @transform_0, window_bounds = array<i64: 7, 44, 16>}, {transform_indices = @transform_1, window_bounds = array<i64: 1>}, {transform_indices = @transform_2, window_bounds = array<i64: 1, 4, 256>}, {transform_indices = @transform_3, window_bounds = array<i64: 1, 16, 16>}]} {
    %c0_i32 = arith.constant 0 : i32
    %0 = arith.cmpi eq, %arg1, %c0_i32 : i32
    %1 = arith.extui %0 : i1 to i32
    %c0_i32_0 = arith.constant 0 : i32
    %2 = arith.cmpi ne, %1, %c0_i32_0 : i32
    scf.if %2 {
      %cst = arith.constant 0.000000e+00 : f32
      %14 = vector.broadcast %cst : f32 to vector<8x256xf32>
      %c0_13 = arith.constant 0 : index
      %c0_14 = arith.constant 0 : index
      %15 = vector.load %arg6[%c0_13, %c0_14] : memref<8x256xf32, #tpu.memory_space<vmem>>, vector<8x256xf32>
      tpu.vector_store %arg6[%c0_13, %c0_14], %14 {strides = array<i32>} : memref<8x256xf32, #tpu.memory_space<vmem>>, vector<8x256xf32>,
      %cst_15 = arith.constant 0xFF800000 : f32
      %16 = vector.broadcast %cst_15 : f32 to vector<8x256xf32>
      %c0_16 = arith.constant 0 : index
      %c0_17 = arith.constant 0 : index
      %17 = vector.load %arg7[%c0_16, %c0_17] : memref<8x256xf32, #tpu.memory_space<vmem>>, vector<8x256xf32>
      tpu.vector_store %arg7[%c0_16, %c0_17], %16 {strides = array<i32>} : memref<8x256xf32, #tpu.memory_space<vmem>>, vector<8x256xf32>,
    } else {
    }
    %c0 = arith.constant 0 : index
    %c0_1 = arith.constant 0 : index
    %c0_2 = arith.constant 0 : index
    %3 = vector.load %arg4[%c0, %c0_1, %c0_2] : memref<1x4x256xf32, #tpu.memory_space<vmem>>, vector<1x4x256xf32>
    %4 = vector.shape_cast %3 : vector<1x4x256xf32> to vector<4x256xf32>
    %c0_3 = arith.constant 0 : index
    %c0_4 = arith.constant 0 : index
    %5 = vector.load %arg6[%c0_3, %c0_4] : memref<8x256xf32, #tpu.memory_space<vmem>>, vector<4x256xf32>
    %6 = arith.addf %5, %4 : vector<4x256xf32>
    %c0_5 = arith.constant 0 : index
    %c0_6 = arith.constant 0 : index
    %7 = vector.load %arg6[%c0_5, %c0_6] : memref<8x256xf32, #tpu.memory_space<vmem>>, vector<4x256xf32>
    tpu.vector_store %arg6[%c0_5, %c0_6], %6 {strides = array<i32>} : memref<8x256xf32, #tpu.memory_space<vmem>>, vector<4x256xf32>,
    %c0_7 = arith.constant 0 : index
    %c0_8 = arith.constant 0 : index
    %8 = vector.load %arg7[%c0_7, %c0_8] : memref<8x256xf32, #tpu.memory_space<vmem>>, vector<4x256xf32>
    %9 = arith.maximumf %8, %4 : vector<4x256xf32>
    %c0_9 = arith.constant 0 : index
    %c0_10 = arith.constant 0 : index
    %10 = vector.load %arg7[%c0_9, %c0_10] : memref<8x256xf32, #tpu.memory_space<vmem>>, vector<4x256xf32>
    tpu.vector_store %arg7[%c0_9, %c0_10], %9 {strides = array<i32>} : memref<8x256xf32, #tpu.memory_space<vmem>>, vector<4x256xf32>,
    %c0_i32_11 = arith.constant 0 : i32
    %11 = arith.cmpi eq, %arg1, %c0_i32_11 : i32
    %12 = arith.extui %11 : i1 to i32
    %c0_i32_12 = arith.constant 0 : i32
    %13 = arith.cmpi ne, %12, %c0_i32_12 : i32
    scf.if %13 {
      %c0_13 = arith.constant 0 : index
      %c0_14 = arith.constant 0 : index
      %14 = vector.load %arg6[%c0_13, %c0_14] : memref<8x256xf32, #tpu.memory_space<vmem>>, vector<8x256xf32>
      %cst = arith.constant dense<0.000000e+00> : vector<256xf32>
      %15 = vector.multi_reduction <add>, %14, %cst [0] : vector<8x256xf32> to vector<256xf32>
      %16 = vector.shape_cast %15 : vector<256xf32> to vector<1x256xf32>
      %c0_15 = arith.constant 0 : index
      %c0_16 = arith.constant 0 : index
      %17 = vector.load %arg7[%c0_15, %c0_16] : memref<8x256xf32, #tpu.memory_space<vmem>>, vector<8x256xf32>
      %cst_17 = arith.constant dense<0xFF800000> : vector<256xf32>
      %18 = vector.multi_reduction <maximumf>, %17, %cst_17 [0] : vector<8x256xf32> to vector<256xf32>
      %19 = vector.shape_cast %18 : vector<256xf32> to vector<1x256xf32>
      %c0_18 = arith.constant 0 : index
      %c0_19 = arith.constant 0 : index
      %20 = vector.load %arg6[%c0_18, %c0_19] : memref<8x256xf32, #tpu.memory_space<vmem>>, vector<1x256xf32>
      tpu.vector_store %arg6[%c0_18, %c0_19], %16 {strides = array<i32>} : memref<8x256xf32, #tpu.memory_space<vmem>>, vector<1x256xf32>,
      %c0_20 = arith.constant 0 : index
      %c0_21 = arith.constant 0 : index
      %21 = vector.load %arg7[%c0_20, %c0_21] : memref<8x256xf32, #tpu.memory_space<vmem>>, vector<1x256xf32>
      tpu.vector_store %arg7[%c0_20, %c0_21], %19 {strides = array<i32>} : memref<8x256xf32, #tpu.memory_space<vmem>>, vector<1x256xf32>,
      %cst_22 = arith.constant 0.000000e+00 : f32
      %22 = vector.broadcast %cst_22 : f32 to vector<22x44xf32>
      %c0_23 = arith.constant 0 : index
      %c0_24 = arith.constant 0 : index
      %23 = vector.load %arg8[%c0_23, %c0_24] : memref<22x44xf32, #tpu.memory_space<vmem>>, vector<22x44xf32>
      tpu.vector_store %arg8[%c0_23, %c0_24], %22 {strides = array<i32>} : memref<22x44xf32, #tpu.memory_space<vmem>>, vector<22x44xf32>,
      %c0_25 = arith.constant 0 : index
      %c0_26 = arith.constant 0 : index
      %24 = vector.load %arg6[%c0_25, %c0_26] : memref<8x256xf32, #tpu.memory_space<vmem>>, vector<1x16xf32>
      %c3 = arith.constant 3 : index
      %c3_27 = arith.constant 3 : index
      %25 = vector.load %arg8[%c3, %c3_27] : memref<22x44xf32, #tpu.memory_space<vmem>>, vector<1x16xf32>
      tpu.vector_store %arg8[%c3, %c3_27], %24 {strides = array<i32>} : memref<22x44xf32, #tpu.memory_space<vmem>>, vector<1x16xf32>,
      %c0_28 = arith.constant 0 : index
      %c0_29 = arith.constant 0 : index
      %26 = vector.load %arg7[%c0_28, %c0_29] : memref<8x256xf32, #tpu.memory_space<vmem>>, vector<1x16xf32>
      %c3_30 = arith.constant 3 : index
      %c25 = arith.constant 25 : index
      %27 = vector.load %arg8[%c3_30, %c25] : memref<22x44xf32, #tpu.memory_space<vmem>>, vector<1x16xf32>
      tpu.vector_store %arg8[%c3_30, %c25], %26 {strides = array<i32>} : memref<22x44xf32, #tpu.memory_space<vmem>>, vector<1x16xf32>,
      %c0_31 = arith.constant 0 : index
      %c16 = arith.constant 16 : index
      %28 = vector.load %arg6[%c0_31, %c16] : memref<8x256xf32, #tpu.memory_space<vmem>>, vector<1x16xf32>
      %c4 = arith.constant 4 : index
      %c3_32 = arith.constant 3 : index
      %29 = vector.load %arg8[%c4, %c3_32] : memref<22x44xf32, #tpu.memory_space<vmem>>, vector<1x16xf32>
      tpu.vector_store %arg8[%c4, %c3_32], %28 {strides = array<i32>} : memref<22x44xf32, #tpu.memory_space<vmem>>, vector<1x16xf32>,
      %c0_33 = arith.constant 0 : index
      %c16_34 = arith.constant 16 : index
      %30 = vector.load %arg7[%c0_33, %c16_34] : memref<8x256xf32, #tpu.memory_space<vmem>>, vector<1x16xf32>
      %c4_35 = arith.constant 4 : index
      %c25_36 = arith.constant 25 : index
      %31 = vector.load %arg8[%c4_35, %c25_36] : memref<22x44xf32, #tpu.memory_space<vmem>>, vector<1x16xf32>
      tpu.vector_store %arg8[%c4_35, %c25_36], %30 {strides = array<i32>} : memref<22x44xf32, #tpu.memory_space<vmem>>, vector<1x16xf32>,
      %c0_37 = arith.constant 0 : index
      %c32 = arith.constant 32 : index
      %32 = vector.load %arg6[%c0_37, %c32] : memref<8x256xf32, #tpu.memory_space<vmem>>, vector<1x16xf32>
      %c5 = arith.constant 5 : index
      %c3_38 = arith.constant 3 : index
      %33 = vector.load %arg8[%c5, %c3_38] : memref<22x44xf32, #tpu.memory_space<vmem>>, vector<1x16xf32>
      tpu.vector_store %arg8[%c5, %c3_38], %32 {strides = array<i32>} : memref<22x44xf32, #tpu.memory_space<vmem>>, vector<1x16xf32>,
      %c0_39 = arith.constant 0 : index
      %c32_40 = arith.constant 32 : index
      %34 = vector.load %arg7[%c0_39, %c32_40] : memref<8x256xf32, #tpu.memory_space<vmem>>, vector<1x16xf32>
      %c5_41 = arith.constant 5 : index
      %c25_42 = arith.constant 25 : index
      %35 = vector.load %arg8[%c5_41, %c25_42] : memref<22x44xf32, #tpu.memory_space<vmem>>, vector<1x16xf32>
      tpu.vector_store %arg8[%c5_41, %c25_42], %34 {strides = array<i32>} : memref<22x44xf32, #tpu.memory_space<vmem>>, vector<1x16xf32>,
      %c0_43 = arith.constant 0 : index
      %c48 = arith.constant 48 : index
      %36 = vector.load %arg6[%c0_43, %c48] : memref<8x256xf32, #tpu.memory_space<vmem>>, vector<1x16xf32>
      %c6 = arith.constant 6 : index
      %c3_44 = arith.constant 3 : index
      %37 = vector.load %arg8[%c6, %c3_44] : memref<22x44xf32, #tpu.memory_space<vmem>>, vector<1x16xf32>
      tpu.vector_store %arg8[%c6, %c3_44], %36 {strides = array<i32>} : memref<22x44xf32, #tpu.memory_space<vmem>>, vector<1x16xf32>,
      %c0_45 = arith.constant 0 : index
      %c48_46 = arith.constant 48 : index
      %38 = vector.load %arg7[%c0_45, %c48_46] : memref<8x256xf32, #tpu.memory_space<vmem>>, vector<1x16xf32>
      %c6_47 = arith.constant 6 : index
      %c25_48 = arith.constant 25 : index
      %39 = vector.load %arg8[%c6_47, %c25_48] : memref<22x44xf32, #tpu.memory_space<vmem>>, vector<1x16xf32>
      tpu.vector_store %arg8[%c6_47, %c25_48], %38 {strides = array<i32>} : memref<22x44xf32, #tpu.memory_space<vmem>>, vector<1x16xf32>,
      %c0_49 = arith.constant 0 : index
      %c64 = arith.constant 64 : index
      %40 = vector.load %arg6[%c0_49, %c64] : memref<8x256xf32, #tpu.memory_space<vmem>>, vector<1x16xf32>
      %c7 = arith.constant 7 : index
      %c3_50 = arith.constant 3 : index
      %41 = vector.load %arg8[%c7, %c3_50] : memref<22x44xf32, #tpu.memory_space<vmem>>, vector<1x16xf32>
      tpu.vector_store %arg8[%c7, %c3_50], %40 {strides = array<i32>} : memref<22x44xf32, #tpu.memory_space<vmem>>, vector<1x16xf32>,
      %c0_51 = arith.constant 0 : index
      %c64_52 = arith.constant 64 : index
      %42 = vector.load %arg7[%c0_51, %c64_52] : memref<8x256xf32, #tpu.memory_space<vmem>>, vector<1x16xf32>
      %c7_53 = arith.constant 7 : index
      %c25_54 = arith.constant 25 : index
      %43 = vector.load %arg8[%c7_53, %c25_54] : memref<22x44xf32, #tpu.memory_space<vmem>>, vector<1x16xf32>
      tpu.vector_store %arg8[%c7_53, %c25_54], %42 {strides = array<i32>} : memref<22x44xf32, #tpu.memory_space<vmem>>, vector<1x16xf32>,
      %c0_55 = arith.constant 0 : index
      %c80 = arith.constant 80 : index
      %44 = vector.load %arg6[%c0_55, %c80] : memref<8x256xf32, #tpu.memory_space<vmem>>, vector<1x16xf32>
      %c8 = arith.constant 8 : index
      %c3_56 = arith.constant 3 : index
      %45 = vector.load %arg8[%c8, %c3_56] : memref<22x44xf32, #tpu.memory_space<vmem>>, vector<1x16xf32>
      tpu.vector_store %arg8[%c8, %c3_56], %44 {strides = array<i32>} : memref<22x44xf32, #tpu.memory_space<vmem>>, vector<1x16xf32>,
      %c0_57 = arith.constant 0 : index
      %c80_58 = arith.constant 80 : index
      %46 = vector.load %arg7[%c0_57, %c80_58] : memref<8x256xf32, #tpu.memory_space<vmem>>, vector<1x16xf32>
      %c8_59 = arith.constant 8 : index
      %c25_60 = arith.constant 25 : index
      %47 = vector.load %arg8[%c8_59, %c25_60] : memref<22x44xf32, #tpu.memory_space<vmem>>, vector<1x16xf32>
      tpu.vector_store %arg8[%c8_59, %c25_60], %46 {strides = array<i32>} : memref<22x44xf32, #tpu.memory_space<vmem>>, vector<1x16xf32>,
      %c0_61 = arith.constant 0 : index
      %c96 = arith.constant 96 : index
      %48 = vector.load %arg6[%c0_61, %c96] : memref<8x256xf32, #tpu.memory_space<vmem>>, vector<1x16xf32>
      %c9 = arith.constant 9 : index
      %c3_62 = arith.constant 3 : index
      %49 = vector.load %arg8[%c9, %c3_62] : memref<22x44xf32, #tpu.memory_space<vmem>>, vector<1x16xf32>
      tpu.vector_store %arg8[%c9, %c3_62], %48 {strides = array<i32>} : memref<22x44xf32, #tpu.memory_space<vmem>>, vector<1x16xf32>,
      %c0_63 = arith.constant 0 : index
      %c96_64 = arith.constant 96 : index
      %50 = vector.load %arg7[%c0_63, %c96_64] : memref<8x256xf32, #tpu.memory_space<vmem>>, vector<1x16xf32>
      %c9_65 = arith.constant 9 : index
      %c25_66 = arith.constant 25 : index
      %51 = vector.load %arg8[%c9_65, %c25_66] : memref<22x44xf32, #tpu.memory_space<vmem>>, vector<1x16xf32>
      tpu.vector_store %arg8[%c9_65, %c25_66], %50 {strides = array<i32>} : memref<22x44xf32, #tpu.memory_space<vmem>>, vector<1x16xf32>,
      %c0_67 = arith.constant 0 : index
      %c112 = arith.constant 112 : index
      %52 = vector.load %arg6[%c0_67, %c112] : memref<8x256xf32, #tpu.memory_space<vmem>>, vector<1x16xf32>
      %c10 = arith.constant 10 : index
      %c3_68 = arith.constant 3 : index
      %53 = vector.load %arg8[%c10, %c3_68] : memref<22x44xf32, #tpu.memory_space<vmem>>, vector<1x16xf32>
      tpu.vector_store %arg8[%c10, %c3_68], %52 {strides = array<i32>} : memref<22x44xf32, #tpu.memory_space<vmem>>, vector<1x16xf32>,
      %c0_69 = arith.constant 0 : index
      %c112_70 = arith.constant 112 : index
      %54 = vector.load %arg7[%c0_69, %c112_70] : memref<8x256xf32, #tpu.memory_space<vmem>>, vector<1x16xf32>
      %c10_71 = arith.constant 10 : index
      %c25_72 = arith.constant 25 : index
      %55 = vector.load %arg8[%c10_71, %c25_72] : memref<22x44xf32, #tpu.memory_space<vmem>>, vector<1x16xf32>
      tpu.vector_store %arg8[%c10_71, %c25_72], %54 {strides = array<i32>} : memref<22x44xf32, #tpu.memory_space<vmem>>, vector<1x16xf32>,
      %c0_73 = arith.constant 0 : index
      %c128 = arith.constant 128 : index
      %56 = vector.load %arg6[%c0_73, %c128] : memref<8x256xf32, #tpu.memory_space<vmem>>, vector<1x16xf32>
      %c11 = arith.constant 11 : index
      %c3_74 = arith.constant 3 : index
      %57 = vector.load %arg8[%c11, %c3_74] : memref<22x44xf32, #tpu.memory_space<vmem>>, vector<1x16xf32>
      tpu.vector_store %arg8[%c11, %c3_74], %56 {strides = array<i32>} : memref<22x44xf32, #tpu.memory_space<vmem>>, vector<1x16xf32>,
      %c0_75 = arith.constant 0 : index
      %c128_76 = arith.constant 128 : index
      %58 = vector.load %arg7[%c0_75, %c128_76] : memref<8x256xf32, #tpu.memory_space<vmem>>, vector<1x16xf32>
      %c11_77 = arith.constant 11 : index
      %c25_78 = arith.constant 25 : index
      %59 = vector.load %arg8[%c11_77, %c25_78] : memref<22x44xf32, #tpu.memory_space<vmem>>, vector<1x16xf32>
      tpu.vector_store %arg8[%c11_77, %c25_78], %58 {strides = array<i32>} : memref<22x44xf32, #tpu.memory_space<vmem>>, vector<1x16xf32>,
      %c0_79 = arith.constant 0 : index
      %c144 = arith.constant 144 : index
      %60 = vector.load %arg6[%c0_79, %c144] : memref<8x256xf32, #tpu.memory_space<vmem>>, vector<1x16xf32>
      %c12 = arith.constant 12 : index
      %c3_80 = arith.constant 3 : index
      %61 = vector.load %arg8[%c12, %c3_80] : memref<22x44xf32, #tpu.memory_space<vmem>>, vector<1x16xf32>
      tpu.vector_store %arg8[%c12, %c3_80], %60 {strides = array<i32>} : memref<22x44xf32, #tpu.memory_space<vmem>>, vector<1x16xf32>,
      %c0_81 = arith.constant 0 : index
      %c144_82 = arith.constant 144 : index
      %62 = vector.load %arg7[%c0_81, %c144_82] : memref<8x256xf32, #tpu.memory_space<vmem>>, vector<1x16xf32>
      %c12_83 = arith.constant 12 : index
      %c25_84 = arith.constant 25 : index
      %63 = vector.load %arg8[%c12_83, %c25_84] : memref<22x44xf32, #tpu.memory_space<vmem>>, vector<1x16xf32>
      tpu.vector_store %arg8[%c12_83, %c25_84], %62 {strides = array<i32>} : memref<22x44xf32, #tpu.memory_space<vmem>>, vector<1x16xf32>,
      %c0_85 = arith.constant 0 : index
      %c160 = arith.constant 160 : index
      %64 = vector.load %arg6[%c0_85, %c160] : memref<8x256xf32, #tpu.memory_space<vmem>>, vector<1x16xf32>
      %c13 = arith.constant 13 : index
      %c3_86 = arith.constant 3 : index
      %65 = vector.load %arg8[%c13, %c3_86] : memref<22x44xf32, #tpu.memory_space<vmem>>, vector<1x16xf32>
      tpu.vector_store %arg8[%c13, %c3_86], %64 {strides = array<i32>} : memref<22x44xf32, #tpu.memory_space<vmem>>, vector<1x16xf32>,
      %c0_87 = arith.constant 0 : index
      %c160_88 = arith.constant 160 : index
      %66 = vector.load %arg7[%c0_87, %c160_88] : memref<8x256xf32, #tpu.memory_space<vmem>>, vector<1x16xf32>
      %c13_89 = arith.constant 13 : index
      %c25_90 = arith.constant 25 : index
      %67 = vector.load %arg8[%c13_89, %c25_90] : memref<22x44xf32, #tpu.memory_space<vmem>>, vector<1x16xf32>
      tpu.vector_store %arg8[%c13_89, %c25_90], %66 {strides = array<i32>} : memref<22x44xf32, #tpu.memory_space<vmem>>, vector<1x16xf32>,
      %c0_91 = arith.constant 0 : index
      %c176 = arith.constant 176 : index
      %68 = vector.load %arg6[%c0_91, %c176] : memref<8x256xf32, #tpu.memory_space<vmem>>, vector<1x16xf32>
      %c14 = arith.constant 14 : index
      %c3_92 = arith.constant 3 : index
      %69 = vector.load %arg8[%c14, %c3_92] : memref<22x44xf32, #tpu.memory_space<vmem>>, vector<1x16xf32>
      tpu.vector_store %arg8[%c14, %c3_92], %68 {strides = array<i32>} : memref<22x44xf32, #tpu.memory_space<vmem>>, vector<1x16xf32>,
      %c0_93 = arith.constant 0 : index
      %c176_94 = arith.constant 176 : index
      %70 = vector.load %arg7[%c0_93, %c176_94] : memref<8x256xf32, #tpu.memory_space<vmem>>, vector<1x16xf32>
      %c14_95 = arith.constant 14 : index
      %c25_96 = arith.constant 25 : index
      %71 = vector.load %arg8[%c14_95, %c25_96] : memref<22x44xf32, #tpu.memory_space<vmem>>, vector<1x16xf32>
      tpu.vector_store %arg8[%c14_95, %c25_96], %70 {strides = array<i32>} : memref<22x44xf32, #tpu.memory_space<vmem>>, vector<1x16xf32>,
      %c0_97 = arith.constant 0 : index
      %c192 = arith.constant 192 : index
      %72 = vector.load %arg6[%c0_97, %c192] : memref<8x256xf32, #tpu.memory_space<vmem>>, vector<1x16xf32>
      %c15 = arith.constant 15 : index
      %c3_98 = arith.constant 3 : index
      %73 = vector.load %arg8[%c15, %c3_98] : memref<22x44xf32, #tpu.memory_space<vmem>>, vector<1x16xf32>
      tpu.vector_store %arg8[%c15, %c3_98], %72 {strides = array<i32>} : memref<22x44xf32, #tpu.memory_space<vmem>>, vector<1x16xf32>,
      %c0_99 = arith.constant 0 : index
      %c192_100 = arith.constant 192 : index
      %74 = vector.load %arg7[%c0_99, %c192_100] : memref<8x256xf32, #tpu.memory_space<vmem>>, vector<1x16xf32>
      %c15_101 = arith.constant 15 : index
      %c25_102 = arith.constant 25 : index
      %75 = vector.load %arg8[%c15_101, %c25_102] : memref<22x44xf32, #tpu.memory_space<vmem>>, vector<1x16xf32>
      tpu.vector_store %arg8[%c15_101, %c25_102], %74 {strides = array<i32>} : memref<22x44xf32, #tpu.memory_space<vmem>>, vector<1x16xf32>,
      %c0_103 = arith.constant 0 : index
      %c208 = arith.constant 208 : index
      %76 = vector.load %arg6[%c0_103, %c208] : memref<8x256xf32, #tpu.memory_space<vmem>>, vector<1x16xf32>
      %c16_104 = arith.constant 16 : index
      %c3_105 = arith.constant 3 : index
      %77 = vector.load %arg8[%c16_104, %c3_105] : memref<22x44xf32, #tpu.memory_space<vmem>>, vector<1x16xf32>
      tpu.vector_store %arg8[%c16_104, %c3_105], %76 {strides = array<i32>} : memref<22x44xf32, #tpu.memory_space<vmem>>, vector<1x16xf32>,
      %c0_106 = arith.constant 0 : index
      %c208_107 = arith.constant 208 : index
      %78 = vector.load %arg7[%c0_106, %c208_107] : memref<8x256xf32, #tpu.memory_space<vmem>>, vector<1x16xf32>
      %c16_108 = arith.constant 16 : index
      %c25_109 = arith.constant 25 : index
      %79 = vector.load %arg8[%c16_108, %c25_109] : memref<22x44xf32, #tpu.memory_space<vmem>>, vector<1x16xf32>
      tpu.vector_store %arg8[%c16_108, %c25_109], %78 {strides = array<i32>} : memref<22x44xf32, #tpu.memory_space<vmem>>, vector<1x16xf32>,
      %c0_110 = arith.constant 0 : index
      %c224 = arith.constant 224 : index
      %80 = vector.load %arg6[%c0_110, %c224] : memref<8x256xf32, #tpu.memory_space<vmem>>, vector<1x16xf32>
      %c17 = arith.constant 17 : index
      %c3_111 = arith.constant 3 : index
      %81 = vector.load %arg8[%c17, %c3_111] : memref<22x44xf32, #tpu.memory_space<vmem>>, vector<1x16xf32>
      tpu.vector_store %arg8[%c17, %c3_111], %80 {strides = array<i32>} : memref<22x44xf32, #tpu.memory_space<vmem>>, vector<1x16xf32>,
      %c0_112 = arith.constant 0 : index
      %c224_113 = arith.constant 224 : index
      %82 = vector.load %arg7[%c0_112, %c224_113] : memref<8x256xf32, #tpu.memory_space<vmem>>, vector<1x16xf32>
      %c17_114 = arith.constant 17 : index
      %c25_115 = arith.constant 25 : index
      %83 = vector.load %arg8[%c17_114, %c25_115] : memref<22x44xf32, #tpu.memory_space<vmem>>, vector<1x16xf32>
      tpu.vector_store %arg8[%c17_114, %c25_115], %82 {strides = array<i32>} : memref<22x44xf32, #tpu.memory_space<vmem>>, vector<1x16xf32>,
      %c0_116 = arith.constant 0 : index
      %c240 = arith.constant 240 : index
      %84 = vector.load %arg6[%c0_116, %c240] : memref<8x256xf32, #tpu.memory_space<vmem>>, vector<1x16xf32>
      %c18 = arith.constant 18 : index
      %c3_117 = arith.constant 3 : index
      %85 = vector.load %arg8[%c18, %c3_117] : memref<22x44xf32, #tpu.memory_space<vmem>>, vector<1x16xf32>
      tpu.vector_store %arg8[%c18, %c3_117], %84 {strides = array<i32>} : memref<22x44xf32, #tpu.memory_space<vmem>>, vector<1x16xf32>,
      %c0_118 = arith.constant 0 : index
      %c240_119 = arith.constant 240 : index
      %86 = vector.load %arg7[%c0_118, %c240_119] : memref<8x256xf32, #tpu.memory_space<vmem>>, vector<1x16xf32>
      %c18_120 = arith.constant 18 : index
      %c25_121 = arith.constant 25 : index
      %87 = vector.load %arg8[%c18_120, %c25_121] : memref<22x44xf32, #tpu.memory_space<vmem>>, vector<1x16xf32>
      tpu.vector_store %arg8[%c18_120, %c25_121], %86 {strides = array<i32>} : memref<22x44xf32, #tpu.memory_space<vmem>>, vector<1x16xf32>,
      %cst_122 = arith.constant 0.000000e+00 : f32
      %88 = vector.broadcast %cst_122 : f32 to vector<16x16xf32>
      %c0_123 = arith.constant 0 : index
      %c0_124 = arith.constant 0 : index
      %89 = vector.load %arg8[%c0_123, %c0_124] : memref<22x44xf32, #tpu.memory_space<vmem>>, vector<16x44xf32>
      %c0_125 = arith.constant 0 : index
      %c0_126 = arith.constant 0 : index
      %c0_127 = arith.constant 0 : index
      %90 = vector.load %arg2[%c0_125, %c0_126, %c0_127] : memref<7x44x16xf32, #tpu.memory_space<vmem>>, vector<1x44x16xf32>
      %91 = vector.shape_cast %90 : vector<1x44x16xf32> to vector<44x16xf32>
      %cst_128 = arith.constant dense<0.000000e+00> : vector<16x16xf32>
      %92 = tpu.matmul %89, %91, %cst_128 {dimension_numbers = #tpu.dot_dimension_numbers<[1], [0], [0], [1], [0, 0, 1, 1], [], []>, precision = #tpu.contract_precision<fp32>} : vector<16x44xf32>, vector<44x16xf32>, vector<16x16xf32> -> vector<16x16xf32>
      %93 = arith.addf %88, %92 : vector<16x16xf32>
      %c1 = arith.constant 1 : index
      %c0_129 = arith.constant 0 : index
      %94 = vector.load %arg8[%c1, %c0_129] : memref<22x44xf32, #tpu.memory_space<vmem>>, vector<16x44xf32>
      %c1_130 = arith.constant 1 : index
      %c0_131 = arith.constant 0 : index
      %c0_132 = arith.constant 0 : index
      %95 = vector.load %arg2[%c1_130, %c0_131, %c0_132] : memref<7x44x16xf32, #tpu.memory_space<vmem>>, vector<1x44x16xf32>
      %96 = vector.shape_cast %95 : vector<1x44x16xf32> to vector<44x16xf32>
      %cst_133 = arith.constant dense<0.000000e+00> : vector<16x16xf32>
      %97 = tpu.matmul %94, %96, %cst_133 {dimension_numbers = #tpu.dot_dimension_numbers<[1], [0], [0], [1], [0, 0, 1, 1], [], []>, precision = #tpu.contract_precision<fp32>} : vector<16x44xf32>, vector<44x16xf32>, vector<16x16xf32> -> vector<16x16xf32>
      %98 = arith.addf %93, %97 : vector<16x16xf32>
      %c2 = arith.constant 2 : index
      %c0_134 = arith.constant 0 : index
      %99 = vector.load %arg8[%c2, %c0_134] : memref<22x44xf32, #tpu.memory_space<vmem>>, vector<16x44xf32>
      %c2_135 = arith.constant 2 : index
      %c0_136 = arith.constant 0 : index
      %c0_137 = arith.constant 0 : index
      %100 = vector.load %arg2[%c2_135, %c0_136, %c0_137] : memref<7x44x16xf32, #tpu.memory_space<vmem>>, vector<1x44x16xf32>
      %101 = vector.shape_cast %100 : vector<1x44x16xf32> to vector<44x16xf32>
      %cst_138 = arith.constant dense<0.000000e+00> : vector<16x16xf32>
      %102 = tpu.matmul %99, %101, %cst_138 {dimension_numbers = #tpu.dot_dimension_numbers<[1], [0], [0], [1], [0, 0, 1, 1], [], []>, precision = #tpu.contract_precision<fp32>} : vector<16x44xf32>, vector<44x16xf32>, vector<16x16xf32> -> vector<16x16xf32>
      %103 = arith.addf %98, %102 : vector<16x16xf32>
      %c3_139 = arith.constant 3 : index
      %c0_140 = arith.constant 0 : index
      %104 = vector.load %arg8[%c3_139, %c0_140] : memref<22x44xf32, #tpu.memory_space<vmem>>, vector<16x44xf32>
      %c3_141 = arith.constant 3 : index
      %c0_142 = arith.constant 0 : index
      %c0_143 = arith.constant 0 : index
      %105 = vector.load %arg2[%c3_141, %c0_142, %c0_143] : memref<7x44x16xf32, #tpu.memory_space<vmem>>, vector<1x44x16xf32>
      %106 = vector.shape_cast %105 : vector<1x44x16xf32> to vector<44x16xf32>
      %cst_144 = arith.constant dense<0.000000e+00> : vector<16x16xf32>
      %107 = tpu.matmul %104, %106, %cst_144 {dimension_numbers = #tpu.dot_dimension_numbers<[1], [0], [0], [1], [0, 0, 1, 1], [], []>, precision = #tpu.contract_precision<fp32>} : vector<16x44xf32>, vector<44x16xf32>, vector<16x16xf32> -> vector<16x16xf32>
      %108 = arith.addf %103, %107 : vector<16x16xf32>
      %c4_145 = arith.constant 4 : index
      %c0_146 = arith.constant 0 : index
      %109 = vector.load %arg8[%c4_145, %c0_146] : memref<22x44xf32, #tpu.memory_space<vmem>>, vector<16x44xf32>
      %c4_147 = arith.constant 4 : index
      %c0_148 = arith.constant 0 : index
      %c0_149 = arith.constant 0 : index
      %110 = vector.load %arg2[%c4_147, %c0_148, %c0_149] : memref<7x44x16xf32, #tpu.memory_space<vmem>>, vector<1x44x16xf32>
      %111 = vector.shape_cast %110 : vector<1x44x16xf32> to vector<44x16xf32>
      %cst_150 = arith.constant dense<0.000000e+00> : vector<16x16xf32>
      %112 = tpu.matmul %109, %111, %cst_150 {dimension_numbers = #tpu.dot_dimension_numbers<[1], [0], [0], [1], [0, 0, 1, 1], [], []>, precision = #tpu.contract_precision<fp32>} : vector<16x44xf32>, vector<44x16xf32>, vector<16x16xf32> -> vector<16x16xf32>
      %113 = arith.addf %108, %112 : vector<16x16xf32>
      %c5_151 = arith.constant 5 : index
      %c0_152 = arith.constant 0 : index
      %114 = vector.load %arg8[%c5_151, %c0_152] : memref<22x44xf32, #tpu.memory_space<vmem>>, vector<16x44xf32>
      %c5_153 = arith.constant 5 : index
      %c0_154 = arith.constant 0 : index
      %c0_155 = arith.constant 0 : index
      %115 = vector.load %arg2[%c5_153, %c0_154, %c0_155] : memref<7x44x16xf32, #tpu.memory_space<vmem>>, vector<1x44x16xf32>
      %116 = vector.shape_cast %115 : vector<1x44x16xf32> to vector<44x16xf32>
      %cst_156 = arith.constant dense<0.000000e+00> : vector<16x16xf32>
      %117 = tpu.matmul %114, %116, %cst_156 {dimension_numbers = #tpu.dot_dimension_numbers<[1], [0], [0], [1], [0, 0, 1, 1], [], []>, precision = #tpu.contract_precision<fp32>} : vector<16x44xf32>, vector<44x16xf32>, vector<16x16xf32> -> vector<16x16xf32>
      %118 = arith.addf %113, %117 : vector<16x16xf32>
      %c6_157 = arith.constant 6 : index
      %c0_158 = arith.constant 0 : index
      %119 = vector.load %arg8[%c6_157, %c0_158] : memref<22x44xf32, #tpu.memory_space<vmem>>, vector<16x44xf32>
      %c6_159 = arith.constant 6 : index
      %c0_160 = arith.constant 0 : index
      %c0_161 = arith.constant 0 : index
      %120 = vector.load %arg2[%c6_159, %c0_160, %c0_161] : memref<7x44x16xf32, #tpu.memory_space<vmem>>, vector<1x44x16xf32>
      %121 = vector.shape_cast %120 : vector<1x44x16xf32> to vector<44x16xf32>
      %cst_162 = arith.constant dense<0.000000e+00> : vector<16x16xf32>
      %122 = tpu.matmul %119, %121, %cst_162 {dimension_numbers = #tpu.dot_dimension_numbers<[1], [0], [0], [1], [0, 0, 1, 1], [], []>, precision = #tpu.contract_precision<fp32>} : vector<16x44xf32>, vector<44x16xf32>, vector<16x16xf32> -> vector<16x16xf32>
      %123 = arith.addf %118, %122 : vector<16x16xf32>
      %c0_163 = arith.constant 0 : index
      %124 = memref.load %arg3[%c0_163] : memref<1xf32, #tpu.memory_space<smem>>
      %125 = vector.broadcast %124 : f32 to vector<16x16xf32>
      %126 = arith.addf %123, %125 : vector<16x16xf32>
      %127 = arith.negf %126 : vector<16x16xf32>
      %128 = math.exp %127 : vector<16x16xf32>
      %cst_164 = arith.constant 1.000000e+00 : f32
      %129 = vector.broadcast %cst_164 : f32 to vector<16x16xf32>
      %130 = arith.addf %129, %128 : vector<16x16xf32>
      %131 = arith.divf %129, %130 : vector<16x16xf32>
      %c0_165 = arith.constant 0 : index
      %c0_166 = arith.constant 0 : index
      %c0_167 = arith.constant 0 : index
      %132 = vector.load %arg5[%c0_165, %c0_166, %c0_167] : memref<1x16x16xf32, #tpu.memory_space<vmem>>, vector<1x16x16xf32>
      %133 = vector.shape_cast %132 : vector<1x16x16xf32> to vector<16x16xf32>
      %134 = vector.shape_cast %131 : vector<16x16xf32> to vector<1x16x16xf32>
      tpu.vector_store %arg5[%c0_165, %c0_166, %c0_167], %134 {strides = array<i32>} : memref<1x16x16xf32, #tpu.memory_space<vmem>>, vector<1x16x16xf32>,
    } else {
    }
    return
  }
  func.func @transform_0(%arg0: i32, %arg1: i32) -> (i32, i32, i32) {
    %c0_i32 = arith.constant 0 : i32
    %c0_i32_0 = arith.constant 0 : i32
    %c0_i32_1 = arith.constant 0 : i32
    %c0_i32_2 = arith.constant 0 : i32
    return %c0_i32, %c0_i32_0, %c0_i32_1 : i32, i32, i32
  }
  func.func @transform_1(%arg0: i32, %arg1: i32) -> i32 {
    %c0_i32 = arith.constant 0 : i32
    %c0_i32_0 = arith.constant 0 : i32
    return %c0_i32 : i32
  }
  func.func @transform_2(%arg0: i32, %arg1: i32) -> (i32, i32, i32) {
    %c0_i32 = arith.constant 0 : i32
    %c0_i32_0 = arith.constant 0 : i32
    return %arg0, %arg1, %c0_i32 : i32, i32, i32
  }
  func.func @transform_3(%arg0: i32, %arg1: i32) -> (i32, i32, i32) {
    %c0_i32 = arith.constant 0 : i32
    %c0_i32_0 = arith.constant 0 : i32
    %c0_i32_1 = arith.constant 0 : i32
    return %arg0, %c0_i32, %c0_i32_0 : i32, i32, i32
  }
}

</mosaic_0001>

<bundles_post_ra>
// kernel: tpu_custom_call.1
= control target key start
LH: loop header
LB: loop body
LE: loop exit
PB: predicated region body
PF: predicated region fallthrough
CT: control target
= control target key end

     0   :  { %s3694_s0 = inlined_call_operand.vmem [shape: f32[7,44,16], index: 0, kind: input, shape index: {}]   ;;  %s3695_s1 = inlined_call_operand.<no memory space> [shape: f32[1], index: 1, kind: input, shape index: {}]   ;;  %s3696_s2 = inlined_call_operand.vmem [shape: f32[2,4,256], index: 2, kind: input, shape index: {}]   ;;  %s3697_s3 = inlined_call_operand.hbm [shape: f32[2,16,16], index: 3, kind: output, shape index: {}]  }
   0x1   :  { %8 = sst [smem:[#allocation5]] %s3695_s1 }
   0x2   :  { %9 = vsyncpa [#allocation7], 0 }
   0x3   :  { %11 = vsyncpa [#allocation7 + $0x1], 0  ;;  %s2718_s14 = smov 0   ;;  %s2720_s15 = smov 0  }
   0x4   :  { %s2722_s16 = smov 0   ;;  %s2724_s17 = smov 0  }
   0x5   :  { %s2726_s18 = smov 0   ;;  %s2728_s19 = smov 0  }
   0x6 LB: > { %s2447_s1 = sadd.s32 4294967295, %s2673_s19   ;;  %s2448_s20 = sadd.s32 4294967294, %s2673_s19   ;;  %s2673_s19 = sphi %s2728_s19, %s17_s19   ;;  %s2669_s18 = sphi %s2726_s18, %s3706_s18   ;;  %s2665_s17 = sphi %s2724_s17, %s3705_s17   ;;  %s2661_s16 = sphi %s2722_s16, %s3704_s16   ;;  %s2657_s15 = sphi %s2720_s15, %s3703_s15   ;;  %s2653_s14 = sphi %s2718_s14, %s3702_s14  }
   0x7   : > { %s29_s21 = sadd.s32 1, %s2669_s18  ;;  %s106_s22 = sadd.s32 1, %s2661_s16 }
   0x8   : > { %p31_p0 = scmp.ge.s32.totalorder %s29_s21, 2  ;;  %p116_p1 = scmp.ne.s32.totalorder %s2661_s16, %s2657_s15 }
   0x9   : > { %p117_p2 = scmp.eq.s32.totalorder %s2447_s1, 1  ;;  %p122_p3 = scmp.ne.s32.totalorder %s2657_s15, %s2653_s14 }
   0xa   : > { %s3708_s21 = smov (%p31_p0, %s29_s21), 0  ;;  %p123_p5 = scmp.eq.s32.totalorder %s2448_s20, 1 }
   0xb   : > { %p2758_p4 = por %p117_p2, %p116_p1  ;;  %s103_s24 = ssub.s32 %s2669_s18, %s3708_s21 }
   0xc   : > { %p2451_p6 = scmp.ge.s32.totalorder %s2673_s19, 1  ;;  %p104_p7 = scmp.eq.s32.totalorder %s103_s24, 0 }
   0xd   : > { %p2765_p8 = por %p123_p5, %p122_p3  ;;  %p159_p9 = scmp.lt.s32.totalorder %s2673_s19, 3 }
   0xe   : > { %s2771_s26 = scalar_select %p104_p7, %s2661_s16, %s106_s22  }
   0xf   : > { %p160_p10 = pnand %p2451_p6, %p159_p9 }
  0x10   : > { %p187_p11 = scmp.lt.s32.totalorder (!%p160_p10), %s2665_s17, 1  ;;  %s2677_s5 = smov (!%p160_p10), 99  }
  0x11   : > { %163 = sbr.rel (%p160_p10) target bundleno = 595 (0x253), region = 32  ;;  %s2678_s6 = smov (!%p160_p10), 3  }
  0x12   : > { %s2679_s7 = smov (!%p160_p10), 67   ;;  %s2680_s8 = smov (!%p160_p10), 83  }
  0x13   : > { %s2681_s9 = smov (!%p160_p10), 115   ;;  %s2682_s10 = smov (!%p160_p10), 51  }
  0x14   : > { %s2683_s11 = smov (!%p160_p10), 19   ;;  %s2684_s12 = smov (!%p160_p10), 35  }
  0x15   : > { %s2685_s13 = smov (!%p160_p10), 121   ;;  %s2686_s1 = smov (!%p160_p10), 9  }
  0x16   : > { %v2675_v0 = vmov 0.0   ;;  %s188_s27 = scalar_select %p187_p11, %s2665_s17, 1  ;;  %v2676_v8 = vmov -inf   ;;  %v265_v27 = vlaneseq  ;;  %vm262_vm0 = vcmask 1040384   ;;  %v2460_v59 = vld [vmem:[%s3694_s0 + $0x58] sm:$0xf] }
  0x17   : > { %200 = vst [vmem:[#allocation2] sm:$0xff] %v2675_v0  ;;  %s2687_s20 = smov 25   ;;  %s2688_s22 = smov 73   ;;  %vm278_vm2 = vcmask 359424   ;;  %vm288_vm3 = vcmask 147480   ;;  %vm281_vm4 = vcmask 357376  }
  0x18   : > { %201 = vst [vmem:[#allocation2 + $0x8] sm:$0xff] %v2675_v0  ;;  %s2498_s28 = sshll.u32 %s188_s27, 3  ;;  %vm2780_vm1 = vcmp.lt.s32.totalorder %v265_v27, 256  ;;  %s2689_s24 = smov 89   ;;  %vm500_vm5 = vcmask 1043456   ;;  %vm295_vm6 = vcmask 327880  }
  0x19   : > { %s195_s4 = scalar_lea.vmem %s3696_s2, %s2498_s28  ;;  %202 = vst [vmem:[#allocation3] sm:$0xff] %v2676_v8  ;;  %s2690_s27 = smov 105   ;;  %v502_v60 = vsel %vm500_vm5, %v2460_v59, 0  ;;  %v481_v59 = vld [vmem:[%s3694_s0 + $0x10] sm:$0xff]  ;;  %vm2349_vm12 = vcmask 130048  }
  0x1a   : > { %v204_v1 = vld [vmem:[%s195_s4] sm:$0xff]  ;;  %203 = vst [vmem:[#allocation3 + $0x8] sm:$0xff] %v2676_v8  ;;  %s2691_s28 = smov 57   ;;  %s2692_s29 = smov 41   ;;  %v2809_v63 = vand.u32 4294901760, %v502_v60 }
  0x1b   : > { %208 = vst [vmem:[#allocation1] ss:$2 sm:$0xff] %v204_v1  ;;  %v2457_v8 = vld [vmem:[%s3694_s0 + $0x40] sm:$0xff] }
  0x1c   : > { %279 = vst.msk [vmem:[#allocation4] sm:$0xff] %vm278_vm2, %v2675_v0  ;;  %648 = vmatpush.msra.mxu3 %v2809_v63  ;;  %515 = vmatpush.msra.mxu0 %v2809_v63 }
  0x1d   : > { %280 = vst.msk [vmem:[#allocation4 + $0x8] sm:$0xff] %vm278_vm2, %v2675_v0 }
  0x1e   : > { %v205_v2 = vld [vmem:[#allocation2] sm:$0xf]  ;;  %282 = vst.msk [vmem:[#allocation4 + $0x10] sm:$0x3f] %vm281_vm4, %v2675_v0 }
  0x1f   : > { %v206_v3 = vld [vmem:[#allocation2 + $0x8] sm:$0xf] }
  0x20   : > { %v217_v13 = vld [vmem:[#allocation3] sm:$0xf] }
  0x21   : > { %v218_v15 = vld [vmem:[#allocation3 + $0x8] sm:$0xf] }
  0x22   : > { %v209_v4 = vld.sshfl [vmem:[#allocation1] sm:$0xff pattern:$0x75316420]  ;;  %v210_v5 = vld.sshfl [vmem:[#allocation1 + $0x8] sm:$0xff pattern:$0x75316420] }
  0x23   : > { %v213_v6 = vadd.f32 %v209_v4, %v205_v2  ;;  %v214_v7 = vadd.f32 %v210_v5, %v206_v3  ;;  %219 = vst [vmem:[#allocation1] ss:$2 sm:$0xff] %v204_v1  ;;  %v2459_v1 = vld [vmem:[%s3694_s0 + $0x50] sm:$0xff]  ;;  %v554_v2 = vsub.f32 %v502_v60, %v2809_v63  ;;  %v2458_v4 = vld [vmem:[%s3694_s0 + $0x48] sm:$0xff] }
  0x24   : > { %v2817_v3 = vand.u32 4294901760, %v2459_v1 }
  0x25   : > { %215 = vst [vmem:[#allocation2] sm:$0xf] %v213_v6  ;;  %v555_v5 = vand.u32 4294901760, %v554_v2  ;;  %610 = vmatpush.msra.mxu2 %v554_v2 }
  0x26   : > { %216 = vst [vmem:[#allocation2 + $0x8] sm:$0xf] %v214_v7  ;;  %v560_v6 = vsub.f32 %v2459_v1, %v2817_v3  ;;  %v2826_v7 = vand.u32 4294901760, %v2458_v4  ;;  %650 = vmatpush.msra.mxu3 %v2817_v3  ;;  %517 = vmatpush.msra.mxu0 %v2817_v3 }
  0x28   : > { %613 = vmatpush.msra.mxu2 %v560_v6  ;;  %652 = vmatpush.msra.mxu3 %v2826_v7 }
  0x29   : > { %519 = vmatpush.msra.mxu0 %v2826_v7 }
  0x2a   : > { %v221_v10 = vld.sshfl [vmem:[#allocation1 + $0x8] sm:$0xff pattern:$0x75316420]  ;;  %v220_v16 = vld.sshfl [vmem:[#allocation1] sm:$0xff pattern:$0x75316420] }
  0x2b   : > { %v224_v18 = vmax.f32 %v217_v13, %v220_v16  ;;  %v225_v19 = vmax.f32 %v218_v15, %v221_v10  ;;  %v561_v10 = vand.u32 4294901760, %v560_v6  ;;  %v2456_v13 = vld [vmem:[%s3694_s0 + $0x38] sm:$0xff] }
  0x2c   : > { %v231_v9 = vld [vmem:[#allocation2] sm:$0xff] }
  0x2d   : > { %v232_v11 = vld [vmem:[#allocation2 + $0x8] sm:$0xff]  ;;  %v233_v12 = vrot.slane %v231_v9, 4  ;;  %226 = vst [vmem:[#allocation3] sm:$0xf] %v224_v18 }
  0x2e   : > { %v239_v14 = vrot.slane %v232_v11, 4  ;;  %227 = vst [vmem:[#allocation3 + $0x8] sm:$0xf] %v225_v19 }
  0x2f   : > { %v234_v17 = vadd.f32 %v233_v12, %v231_v9  ;;  %v556_v9 = vsub.f32 %v554_v2, %v555_v5  ;;  %v2834_v12 = vand.u32 4294901760, %v2457_v8 }
  0x30   : > { %v240_v20 = vadd.f32 %v239_v14, %v232_v11  ;;  %v566_v11 = vsub.f32 %v2458_v4, %v2826_v7 }
  0x31   : > { %v235_v21 = vrot.slane %v234_v17, 2  ;;  %v557_v16 = vand.u32 4294901760, %v556_v9  ;;  %v572_v19 = vsub.f32 %v2457_v8, %v2834_v12  ;;  %654 = vmatpush.msra.mxu3 %v2834_v12  ;;  %521 = vmatpush.msra.mxu0 %v2834_v12 }
  0x32   : > { %v241_v22 = vrot.slane %v240_v20, 2  ;;  %v567_v18 = vand.u32 4294901760, %v566_v11  ;;  %616 = vmatpush.msra.mxu2 %v566_v11 }
  0x33   : > { %v236_v23 = vadd.f32 %v235_v21, %v234_v17  ;;  %v562_v17 = vsub.f32 %v560_v6, %v561_v10  ;;  %v522_v21 = vand.u32 4294901760, %v2456_v13  ;;  %558 = vmatpush.msra.mxu1 %v557_v16  ;;  %v479_v6 = vld [vmem:[%s3694_s0] sm:$0xff] }
  0x34   : > { %v242_v24 = vadd.f32 %v241_v22, %v240_v20  ;;  %v245_v30 = vld [vmem:[#allocation3] sm:$0xff]  ;;  %v2455_v22 = vld [vmem:[%s3694_s0 + $0x30] sm:$0xff]  ;;  %619 = vmatpush.msra.mxu2 %v572_v19 }
  0x35   : > { %v237_v25 = vrot.slane %v236_v23, 1  ;;  %v246_v31 = vld [vmem:[#allocation3 + $0x8] sm:$0xff]  ;;  %v247_v32 = vrot.slane %v245_v30, 4  ;;  %v578_v27 = vsub.f32 %v2456_v13, %v522_v21  ;;  %656 = vmatpush.msra.mxu3 %v522_v21  ;;  %523 = vmatpush.msra.mxu0 %v522_v21 }
  0x36   : > { %v243_v26 = vrot.slane %v242_v24, 1  ;;  %v253_v35 = vrot.slane %v246_v31, 4 }
  0x37   : > { %v238_v28 = vadd.f32 %v237_v25, %v236_v23  ;;  %v248_v36 = vmax.f32 %v245_v30, %v247_v32  ;;  %v563_v23 = vand.u32 4294901760, %v562_v17  ;;  %v573_v25 = vand.u32 4294901760, %v572_v19  ;;  %622 = vmatpush.msra.mxu2 %v578_v27 }
  0x38   : > { %v244_v29 = vadd.f32 %v243_v26, %v242_v24  ;;  %v254_v38 = vmax.f32 %v246_v31, %v253_v35  ;;  %v568_v24 = vsub.f32 %v566_v11, %v567_v18  ;;  %v524_v26 = vand.u32 4294901760, %v2455_v22 }
  0x39   : > { %v249_v39 = vrot.slane %v248_v36, 2  ;;  %564 = vmatpush.msra.mxu1 %v563_v23  ;;  %v579_v31 = vand.u32 4294901760, %v578_v27 }
  0x3a   : > { %v261_v33 = vrot.slane %v244_v29, 7  ;;  %v255_v40 = vrot.slane %v254_v38, 2  ;;  %v574_v29 = vsub.f32 %v572_v19, %v573_v25  ;;  %v584_v30 = vsub.f32 %v2455_v22, %v524_v26  ;;  %658 = vmatpush.msra.mxu3 %v524_v26  ;;  %525 = vmatpush.msra.mxu0 %v524_v26 }
  0x3b   : > { %v250_v41 = vmax.f32 %v248_v36, %v249_v39  ;;  %v580_v34 = vsub.f32 %v578_v27, %v579_v31 }
  0x3c   : > { %v263_v37 = vsel %vm262_vm0, %v238_v28, %v261_v33  ;;  %v256_v42 = vmax.f32 %v254_v38, %v255_v40  ;;  %v569_v28 = vand.u32 4294901760, %v568_v24  ;;  %v575_v32 = vand.u32 4294901760, %v574_v29  ;;  %625 = vmatpush.msra.mxu2 %v584_v30  ;;  %685 = vmatpush.msrb.mxu0 %v555_v5 }
  0x3d   : > { %269 = vst.msk [vmem:[#allocation2] ss:$8 sm:$0x3] %vm2780_vm1, %v263_v37  ;;  %v251_v43 = vrot.slane %v250_v41, 1  ;;  %v585_v33 = vand.u32 4294901760, %v584_v30  ;;  %v581_v39 = vand.u32 4294901760, %v580_v34 }
  0x3e   : > { %v257_v44 = vrot.slane %v256_v42, 1  ;;  %570 = vmatpush.msra.mxu1 %v569_v28  ;;  %689 = vmatpush.msrb.mxu0 %v561_v10  ;;  %v2917_v10 = vand.u32 4294901760, %v479_v6 }
  0x3f   : > { %v252_v46 = vmax.f32 %v250_v41, %v251_v43  ;;  %v586_v37 = vsub.f32 %v584_v30, %v585_v33 }
  0x40   : > { %v258_v47 = vmax.f32 %v256_v42, %v257_v44  ;;  %576 = vmatpush.msra.mxu1 %v575_v32  ;;  %693 = vmatpush.msrb.mxu0 %v567_v18  ;;  %v2925_v16 = vsub.f32 %v479_v6, %v2917_v10 }
  0x41   : > { %v587_v40 = vand.u32 4294901760, %v586_v37 }
  0x42   : > { %v273_v48 = vrot.slane %v258_v47, 7  ;;  %582 = vmatpush.msra.mxu1 %v581_v39  ;;  %697 = vmatpush.msrb.mxu0 %v573_v25  ;;  %v484_v47 = vld [vmem:[%s3694_s0 + $0x28] sm:$0xf]  ;;  %v2465_v39 = vld [vmem:[%s3694_s0 + $0x80] sm:$0xff] }
  0x44   : > { %v309_v45 = vld [vmem:[#allocation2] ss:$0 sm:$0xff]  ;;  %v274_v49 = vsel %vm262_vm0, %v252_v46, %v273_v48  ;;  %v405_v50 = vld [vmem:[#allocation2 + $0x8] ss:$0 sm:$0xff]  ;;  %588 = vmatpush.msra.mxu1 %v587_v40  ;;  %701 = vmatpush.msrb.mxu0 %v579_v31  ;;  %v753_v48 = vsel %vm500_vm5, %v484_v47, 0 }
  0x45   : > { %311 = vrot.lane.b32.xlu1 %v309_v45, %s2677_s5  ;;  %285 = vrot.lane.b32.xlu0 %v309_v45, %s2678_s6  ;;  %276 = vst.msk [vmem:[#allocation3] ss:$8 sm:$0x3] %vm2780_vm1, %v274_v49  ;;  %v2867_v49 = vand.u32 4294901760, %v753_v48 }
  0x46   : > { %335 = vrot.lane.b32.xlu2 %v309_v45, %s2679_s7  ;;  %726 = vmatpush.msrb.mxu1 %v2809_v63 }
  0x47   : > { %705 = vmatpush.msrb.mxu0 %v585_v33  ;;  %766 = vmatpush.msrb.mxu2 %v2867_v49  ;;  %v2466_v33 = vld [vmem:[%s3694_s0 + $0x88] sm:$0xf] }
  0x48   : > { %728 = vmatpush.msrb.mxu1 %v2817_v3 }
  0x4a   : > { %730 = vmatpush.msrb.mxu1 %v2826_v7 }
  0x4c   : > { %v303_v51 = vld [vmem:[#allocation3] ss:$0 sm:$0xff]  ;;  %v387_v52 = vld [vmem:[#allocation3 + $0x8] ss:$0 sm:$0xff]  ;;  %732 = vmatpush.msrb.mxu1 %v2834_v12 }
  0x4d   : > { %323 = vrot.lane.b32.xlu1 %v309_v45, %s2680_s8  ;;  %299 = vrot.lane.b32.xlu0 %v309_v45, %s2681_s9 }
  0x4e   : > { %347 = vrot.lane.b32.xlu2 %v309_v45, %s2682_s10  ;;  %734 = vmatpush.msrb.mxu1 %v522_v21  ;;  %v836_v21 = vand.u32 4294901760, %v2925_v16 }
  0x50   : > { %736 = vmatpush.msrb.mxu1 %v524_v26  ;;  %v837_v24 = vsub.f32 %v2925_v16, %v836_v21 }
  0x52   : > { %v838_v27 = vand.u32 4294901760, %v837_v24 }
  0x55   : > { %371 = vrot.lane.b32.xlu1 %v309_v45, %s2683_s11  ;;  %359 = vrot.lane.b32.xlu0 %v309_v45, %s2684_s12 }
  0x56   : > { %383 = vrot.lane.b32.xlu2 %v405_v50, %s2678_s6 }
  0x5d   : > { %407 = vrot.lane.b32.xlu1 %v405_v50, %s2677_s5  ;;  %395 = vrot.lane.b32.xlu0 %v405_v50, %s2681_s9 }
  0x5e   : > { %419 = vrot.lane.b32.xlu2 %v405_v50, %s2680_s8 }
  0x65   : > { %443 = vrot.lane.b32.xlu1 %v405_v50, %s2682_s10  ;;  %431 = vrot.lane.b32.xlu0 %v405_v50, %s2679_s7 }
  0x66   : > { %317 = vrot.lane.b32.xlu2 %v303_v51, %s2685_s13 }
  0x6d   : > { %305 = vrot.lane.b32.xlu1 %v303_v51, %s2686_s1  ;;  %292 = vrot.lane.b32.xlu0 %v303_v51, %s2687_s20 }
  0x6e   : > { %353 = vrot.lane.b32.xlu2 %v303_v51, %s2688_s22 }
  0x75   : > { %341 = vrot.lane.b32.xlu1 %v303_v51, %s2689_s24  ;;  %329 = vrot.lane.b32.xlu0 %v303_v51, %s2690_s27 }
  0x76   : > { %365 = vrot.lane.b32.xlu2 %v303_v51, %s2691_s28 }
  0x7d   : > { %389 = vrot.lane.b32.xlu1 %v387_v52, %s2687_s20  ;;  %377 = vrot.lane.b32.xlu0 %v303_v51, %s2692_s29  ;;  %v2874_v51 = vsub.f32 %v753_v48, %v2867_v49  ;;  %s2307_s20 = sld [smem:[#allocation5]] }
  0x7e   : > { %401 = vrot.lane.b32.xlu2 %v387_v52, %s2686_s1 }
  0x85   : > { %425 = vrot.lane.b32.xlu1 %v387_v52, %s2690_s27  ;;  %413 = vrot.lane.b32.xlu0 %v387_v52, %s2685_s13  ;;  %s2499_s27 = sshll.u32 %s2665_s17, 4 }
  0x86   : > { %437 = vrot.lane.b32.xlu2 %v387_v52, %s2689_s24  ;;  %s2364_s30 = scalar_lea.hbm %s3697_s3, %s2499_s27 }
  0x87   : > { %s2367_s17 = sshll.u32 %s2364_s30, 4  ;;  %s2368_s17 = int_to_ptr.hbm [resolvable:$true] %s2367_s17 }
  0x88   : > { %s2609_s7 = sshra.s32 %s2368_s17, 4  ;;  %s2610_s7 = int_to_ptr.hbm [resolvable:$true] %s2609_s7 }
  0x89   : > { %s2611_s8 = scalar_lea.hbm %s2610_s7, 16  ;;  %p2616_p1 = scmp.lt.s32.totalorder %s2610_s7, %s3697_s3 }
  0x8a   : > { %p2612_p12 = scmp.ne.s32.totalorder %s2610_s7, %s2611_s8 }
  0x8c   : > { %p2613_p13 = pnand %p2612_p12, %p2758_p4 }
  0x8d   : > { %455 = vrot.lane.b32.xlu1 %v405_v50, %s2684_s12  ;;  %449 = vrot.lane.b32.xlu0 %v387_v52, %s2688_s22  ;;  %s184_s22 = sand.u32 1, %s2657_s15  }
  0x8e   : > { %461 = vrot.lane.b32.xlu2 %v387_v52, %s2691_s28  ;;  %s2452_s24 = sshll.u32 %s184_s22, 4  ;;  %s2353_s6 = scalar_lea.sflag [#allocation7], %s184_s22 }
  0x8f   : > { %s186_s4 = scalar_lea.vmem [#allocation6], %s2452_s24  ;;  %p2614_p0 = pneg %p2613_p13 }
  0x90   : > { %s2365_s5 = sshll.u32 %s186_s4, 4  ;;  %s2366_s5 = int_to_ptr.vmem [resolvable:$true] %s2365_s5 }
  0x95   : > { %467 = vrot.lane.b32.xlu0 %v405_v50, %s2683_s11  ;;  %473 = vrot.lane.b32.xlu1 %v387_v52, %s2692_s29  ;;  %v483_v50 = vld [vmem:[%s3694_s0 + $0x20] sm:$0xff]  ;;  %s2615_s11 = scalar_lea.hbm %s3697_s3, 32 }
  0x96   : > { %v2876_v52 = vand.u32 4294901760, %v483_v50  ;;  %p2617_p2 = scmp.lt.s32.totalorder %s2615_s11, %s2611_s8 }
  0x98   : > { %768 = vmatpush.msrb.mxu2 %v2876_v52  ;;  %p2618_p3 = por %p2617_p2, %p2616_p1 }
  0x9a   : > { %p2619_p5 = pnand %p2618_p3, %p2614_p0 }
  0xa0   : > { %v336_v53 = vpop.permute.xlu2 %335 }
  0xa1   : > { %338 = vst.msk [vmem:[#allocation4 + $0x7] sm:$0x1] %vm288_vm3, %v336_v53  ;;  %v482_v53 = vld [vmem:[%s3694_s0 + $0x18] sm:$0xff] }
  0xa8   : > { %v348_v54 = vpop.permute.xlu2 %347 }
  0xa9   : > { %350 = vst.msk [vmem:[#allocation4 + $0x8] sm:$0x1] %vm288_vm3, %v348_v54 }
  0xb0   : > { %v384_v55 = vpop.permute.xlu2 %383 }
  0xb1   : > { %386 = vst.msk [vmem:[#allocation4 + $0xb] sm:$0x1] %vm288_vm3, %v384_v55 }
  0xb7   : > { %v312_v56 = vpop.permute.xlu1 %311  ;;  %v286_v57 = vpop.permute.xlu0 %285 }
  0xb8   : > { %314 = vst.msk [vmem:[#allocation4 + $0x5] sm:$0x1] %vm288_vm3, %v312_v56  ;;  %v420_v58 = vpop.permute.xlu2 %419  ;;  %v806_v56 = vand.u32 4294901760, %v2874_v51 }
  0xb9   : > { %289 = vst.msk [vmem:[#allocation4 + $0x3] sm:$0x1] %vm288_vm3, %v286_v57  ;;  %v2884_v57 = vsub.f32 %v483_v50, %v2876_v52 }
  0xba   : > { %422 = vst.msk [vmem:[#allocation4 + $0xe] sm:$0x1] %vm288_vm3, %v420_v58  ;;  %v2886_v58 = vand.u32 4294901760, %v482_v53  ;;  %v807_v60 = vsub.f32 %v2874_v51, %v806_v56 }
  0xbc   : > { %770 = vmatpush.msrb.mxu2 %v2886_v58  ;;  %v2899_v63 = vsub.f32 %v482_v53, %v2886_v58  ;;  %v808_v1 = vand.u32 4294901760, %v807_v60  ;;  %v2463_v53 = vld [vmem:[%s3694_s0 + $0x70] sm:$0xff] }
  0xbe   : > { %v818_v3 = vand.u32 4294901760, %v2899_v63  ;;  %809 = vmatpush.msrb.mxu3 %v808_v1  ;;  %v2461_v1 = vld [vmem:[%s3694_s0 + $0x60] sm:$0xff] }
  0xbf   : > { %v324_v61 = vpop.permute.xlu1 %323  ;;  %v300_v62 = vpop.permute.xlu0 %299 }
  0xc0   : > { %326 = vst.msk [vmem:[#allocation4 + $0x6] sm:$0x1] %vm288_vm3, %v324_v61  ;;  %v318_v0 = vpop.permute.xlu2 %317  ;;  %v812_v61 = vand.u32 4294901760, %v2884_v57  ;;  %v819_v8 = vsub.f32 %v2899_v63, %v818_v3 }
  0xc1   : > { %302 = vst.msk [vmem:[#allocation4 + $0x4] sm:$0x1] %vm288_vm3, %v300_v62  ;;  %v2896_v62 = vand.u32 4294901760, %v481_v59 }
  0xc2   : > { %320 = vst.msk [vmem:[#allocation4 + $0x5] sm:$0x1] %vm295_vm6, %v318_v0  ;;  %v480_v0 = vld [vmem:[%s3694_s0 + $0x8] sm:$0xff]  ;;  %v813_v2 = vsub.f32 %v2884_v57, %v812_v61 }
  0xc3   : > { %772 = vmatpush.msrb.mxu2 %v2896_v62  ;;  %v2908_v4 = vsub.f32 %v481_v59, %v2896_v62  ;;  %v2910_v5 = vand.u32 4294901760, %v480_v0  ;;  %v2462_v59 = vld [vmem:[%s3694_s0 + $0x68] sm:$0xff] }
  0xc4   : > { %v814_v7 = vand.u32 4294901760, %v813_v2 }
  0xc5   : > { %v824_v9 = vand.u32 4294901760, %v2908_v4  ;;  %774 = vmatpush.msrb.mxu2 %v2910_v5  ;;  %v2921_v11 = vsub.f32 %v480_v0, %v2910_v5 }
  0xc6   : > { %815 = vmatpush.msrb.mxu3 %v814_v7 }
  0xc7   : > { %v372_v14 = vpop.permute.xlu1 %371  ;;  %v360_v15 = vpop.permute.xlu0 %359  ;;  %v830_v18 = vand.u32 4294901760, %v2921_v11  ;;  %776 = vmatpush.msrb.mxu2 %v2917_v10 }
  0xc8   : > { %374 = vst.msk [vmem:[#allocation4 + $0xa] sm:$0x1] %vm288_vm3, %v372_v14  ;;  %v354_v20 = vpop.permute.xlu2 %353  ;;  %v820_v14 = vand.u32 4294901760, %v819_v8  ;;  %v3029_v8 = vand.u32 4294901760, %v2461_v1 }
  0xc9   : > { %362 = vst.msk [vmem:[#allocation4 + $0x9] sm:$0x1] %vm288_vm3, %v360_v15  ;;  %v825_v15 = vsub.f32 %v2908_v4, %v824_v9  ;;  %v831_v23 = vsub.f32 %v2921_v11, %v830_v18 }
  0xca   : > { %356 = vst.msk [vmem:[#allocation4 + $0x8] sm:$0x1] %vm295_vm6, %v354_v20  ;;  %821 = vmatpush.msrb.mxu3 %v820_v14 }
  0xcb   : > { %v826_v20 = vand.u32 4294901760, %v825_v15  ;;  %v832_v26 = vand.u32 4294901760, %v831_v23 }
  0xcd   : > { %827 = vmatpush.msrb.mxu3 %v826_v20 }
  0xcf   : > { %v408_v35 = vpop.permute.xlu1 %407  ;;  %v396_v36 = vpop.permute.xlu0 %395  ;;  %833 = vmatpush.msrb.mxu3 %v832_v26  ;;  %v2471_v26 = vld [vmem:[%s3694_s0 + $0xb0] sm:$0xff] }
  0xd0   : > { %410 = vst.msk [vmem:[#allocation4 + $0xd] sm:$0x1] %vm288_vm3, %v408_v35  ;;  %v366_v38 = vpop.permute.xlu2 %365 }
  0xd1   : > { %398 = vst.msk [vmem:[#allocation4 + $0xc] sm:$0x1] %vm288_vm3, %v396_v36  ;;  %839 = vmatpush.msrb.mxu3 %v838_v27  ;;  %v1013_v36 = vsel %vm500_vm5, %v2466_v33, 0 }
  0xd2   : > { %368 = vst.msk [vmem:[#allocation4 + $0x9] sm:$0x1] %vm295_vm6, %v366_v38 }
  0xd7   : > { %v444_v41 = vpop.permute.xlu1 %443  ;;  %v432_v42 = vpop.permute.xlu0 %431 }
  0xd8   : > { %446 = vst.msk [vmem:[#allocation4 + $0x10] sm:$0x1] %vm288_vm3, %v444_v41  ;;  %v402_v43 = vpop.permute.xlu2 %401  ;;  %v2963_v41 = vand.u32 4294901760, %v1013_v36 }
  0xd9   : > { %434 = vst.msk [vmem:[#allocation4 + $0xf] sm:$0x1] %vm288_vm3, %v432_v42  ;;  %v2969_v42 = vand.u32 4294901760, %v2465_v39 }
  0xda   : > { %404 = vst.msk [vmem:[#allocation4 + $0xc] sm:$0x1] %vm295_vm6, %v402_v43  ;;  %v2464_v43 = vld [vmem:[%s3694_s0 + $0x78] sm:$0xff] }
  0xdb   : > { %v2981_v47 = vand.u32 4294901760, %v2464_v43  ;;  %v2984_v50 = vsub.f32 %v2465_v39, %v2969_v42 }
  0xdd   : > { %v1072_v60 = vand.u32 4294901760, %v2984_v50 }
  0xdf   : > { %v306_v44 = vpop.permute.xlu1 %305  ;;  %v293_v45 = vpop.permute.xlu0 %292  ;;  %v1073_v6 = vsub.f32 %v2984_v50, %v1072_v60 }
  0xe0   : > { %308 = vst.msk [vmem:[#allocation4 + $0x4] sm:$0x1] %vm295_vm6, %v306_v44  ;;  %v438_v46 = vpop.permute.xlu2 %437 }
  0xe1   : > { %296 = vst.msk [vmem:[#allocation4 + $0x3] sm:$0x1] %vm295_vm6, %v293_v45  ;;  %v2978_v45 = vsub.f32 %v1013_v36, %v2963_v41  ;;  %v2469_v36 = vld [vmem:[%s3694_s0 + $0xa0] sm:$0xff] }
  0xe2   : > { %440 = vst.msk [vmem:[#allocation4 + $0xf] sm:$0x1] %vm295_vm6, %v438_v46 }
  0xe7   : > { %v342_v54 = vpop.permute.xlu1 %341  ;;  %v330_v55 = vpop.permute.xlu0 %329 }
  0xe8   : > { %344 = vst.msk [vmem:[#allocation4 + $0x7] sm:$0x1] %vm295_vm6, %v342_v54  ;;  %v462_v34 = vpop.permute.xlu2 %461 }
  0xe9   : > { %332 = vst.msk [vmem:[#allocation4 + $0x6] sm:$0x1] %vm295_vm6, %v330_v55 }
  0xef   : > { %v390_v12 = vpop.permute.xlu1 %389  ;;  %v378_v13 = vpop.permute.xlu0 %377 }
  0xf0   : > { %392 = vst.msk [vmem:[#allocation4 + $0xb] sm:$0x1] %vm295_vm6, %v390_v12  ;;  %v485_v17 = vld [vmem:[#allocation4 + $0x1] sm:$0xff] }
  0xf1   : > { %380 = vst.msk [vmem:[#allocation4 + $0xa] sm:$0x1] %vm295_vm6, %v378_v13  ;;  %v495_v19 = vsel %vm278_vm2, %v485_v17, 0  ;;  %v477_v35 = vld [vmem:[#allocation4] sm:$0xff]  ;;  %v1074_v17 = vand.u32 4294901760, %v1073_v6 }
  0xf2   : > { %v2933_v22 = vand.u32 4294901760, %v495_v19  ;;  %v747_v40 = vsel %vm278_vm2, %v477_v35, 0 }
  0xf3   : > { %v2974_v44 = vand.u32 4294901760, %v747_v40 }
  0xf4   : > { %590 = vmatmul.f32.vlgmr.msra.gmra.mxu1 %v2933_v22  ;;  %v527_v25 = vsub.f32 %v495_v19, %v2933_v22  ;;  %v3048_v19 = vsub.f32 %v2461_v1, %v3029_v8 }
  0xf5   : > { %899 = vmatpush.msra.mxu1 %v2867_v49 }
  0xf6   : > { %628 = vmatmul.f32.vlgmr.msra.gmra.mxu2 %v527_v25  ;;  %v528_v28 = vand.u32 4294901760, %v527_v25 }
  0xf7   : > { %v426_v29 = vpop.permute.xlu1 %425  ;;  %v414_v30 = vpop.permute.xlu0 %413  ;;  %936 = vmatpush.msra.mxu2 %v806_v56  ;;  %901 = vmatpush.msra.mxu1 %v2876_v52  ;;  %v1066_v56 = vand.u32 4294901760, %v2978_v45 }
  0xf8   : > { %428 = vst.msk [vmem:[#allocation4 + $0xe] sm:$0x1] %vm295_vm6, %v426_v29  ;;  %662 = vmatmul.f32.vlgmr.msra.gmra.mxu3 %v528_v28  ;;  %v529_v31 = vsub.f32 %v527_v25, %v528_v28  ;;  %v1096_v29 = vand.u32 4294901760, %v3048_v19 }
  0xf9   : > { %416 = vst.msk [vmem:[#allocation4 + $0xd] sm:$0x1] %vm295_vm6, %v414_v30  ;;  %940 = vmatpush.msra.mxu2 %v812_v61  ;;  %977 = vmatpush.msra.mxu3 %v2867_v49  ;;  %v3007_v61 = vand.u32 4294901760, %v2463_v53  ;;  %v1067_v2 = vsub.f32 %v2978_v45, %v1066_v56  ;;  %v3064_v30 = vand.u32 4294901760, %v2471_v26 }
  0xfa   : > { %v530_v32 = vand.u32 4294901760, %v529_v31  ;;  %903 = vmatpush.msra.mxu1 %v2886_v58  ;;  %v2470_v31 = vld [vmem:[%s3694_s0 + $0xa8] sm:$0xff] }
  0xfb   : > { %944 = vmatpush.msra.mxu2 %v818_v3  ;;  %979 = vmatpush.msra.mxu3 %v2876_v52  ;;  %v2989_v52 = vsub.f32 %v747_v40, %v2974_v44  ;;  %v3020_v3 = vand.u32 4294901760, %v2462_v59  ;;  %v3027_v7 = vsub.f32 %v2463_v53, %v3007_v61  ;;  %v1068_v12 = vand.u32 4294901760, %v1067_v2 }
  0xfc   : > { %531 = vmatmul.f32.vlgmr.msra.gmra.mxu0 %v530_v32  ;;  %905 = vmatpush.msra.mxu1 %v2896_v62  ;;  %v3081_v35 = vand.u32 4294901760, %v2470_v31  ;;  %v3092_v39 = vsub.f32 %v2471_v26, %v3064_v30 }
  0xfd   : > { %861 = vmatpush.msra.mxu0 %v2874_v51  ;;  %948 = vmatpush.msra.mxu2 %v824_v9  ;;  %v3038_v13 = vsub.f32 %v2462_v59, %v3020_v3 }
  0xfe   : > { %981 = vmatpush.msra.mxu3 %v2886_v58  ;;  %907 = vmatpush.msra.mxu1 %v2910_v5  ;;  %v3001_v58 = vsub.f32 %v2464_v43, %v2981_v47  ;;  %v2468_v43 = vld [vmem:[%s3694_s0 + $0x98] sm:$0xff] }
  0xff   : > { %v456_v37 = vpop.permute.xlu1 %455  ;;  %v450_v38 = vpop.permute.xlu0 %449  ;;  %864 = vmatpush.msra.mxu0 %v2884_v57  ;;  %952 = vmatpush.msra.mxu2 %v830_v18  ;;  %v1084_v18 = vand.u32 4294901760, %v3027_v7  ;;  %v1090_v24 = vand.u32 4294901760, %v3038_v13 }
 0x100   : > { %458 = vst.msk [vmem:[#allocation4 + $0x11] sm:$0x1] %vm288_vm3, %v456_v37  ;;  %983 = vmatpush.msra.mxu3 %v2896_v62  ;;  %909 = vmatpush.msra.mxu1 %v2917_v10  ;;  %v478_v46 = vld [vmem:[#allocation4 + $0x8] sm:$0xff] }
 0x101   : > { %452 = vst.msk [vmem:[#allocation4 + $0x10] sm:$0x1] %vm295_vm6, %v450_v38  ;;  %867 = vmatpush.msra.mxu0 %v2899_v63  ;;  %956 = vmatpush.msra.mxu2 %v836_v21  ;;  %v750_v55 = vsel %vm278_vm2, %v478_v46, 0  ;;  %v779_v63 = vand.u32 4294901760, %v2989_v52  ;;  %v1085_v28 = vsub.f32 %v3027_v7, %v1084_v18  ;;  %v1091_v33 = vsub.f32 %v3038_v13, %v1090_v24 }
 0x102   : > { %464 = vst.msk [vmem:[#allocation4 + $0x11] sm:$0x1] %vm295_vm6, %v462_v34  ;;  %985 = vmatpush.msra.mxu3 %v2910_v5  ;;  %v3012_v0 = vand.u32 4294901760, %v750_v55  ;;  %v1078_v5 = vand.u32 4294901760, %v3001_v58  ;;  %v1097_v38 = vsub.f32 %v3048_v19, %v1096_v29 }
 0x103   : > { %870 = vmatpush.msra.mxu0 %v2908_v4  ;;  %v1086_v37 = vand.u32 4294901760, %v1085_v28  ;;  %v1092_v46 = vand.u32 4294901760, %v1091_v33 }
 0x104   : > { %987 = vmatpush.msra.mxu3 %v2917_v10  ;;  %v780_v10 = vsub.f32 %v2989_v52, %v779_v63  ;;  %v1079_v15 = vsub.f32 %v3001_v58, %v1078_v5  ;;  %v1098_v53 = vand.u32 4294901760, %v1097_v38  ;;  %v2475_v38 = vld [vmem:[%s3694_s0 + $0xd0] sm:$0xff] }
 0x105   : > { %873 = vmatpush.msra.mxu0 %v2921_v11  ;;  %v3035_v11 = vsub.f32 %v750_v55, %v3012_v0  ;;  %v3113_v55 = vand.u32 4294901760, %v2468_v43 }
 0x106   : > { %v781_v21 = vand.u32 4294901760, %v780_v10  ;;  %v1080_v27 = vand.u32 4294901760, %v1079_v15 }
 0x107   : > { %v468_v48 = vpop.permute.xlu0 %467  ;;  %v474_v49 = vpop.permute.xlu1 %473  ;;  %876 = vmatpush.msra.mxu0 %v2925_v16  ;;  %v2472_v16 = vld [vmem:[%s3694_s0 + $0xb8] sm:$0xf]  ;;  %v787_v23 = vand.u32 4294901760, %v3035_v11  ;;  %v3134_v6 = vsub.f32 %v2468_v43, %v3113_v55 }
 0x108   : > { %470 = vst.msk [vmem:[#allocation4 + $0x12] sm:$0x1] %vm288_vm3, %v468_v48  ;;  %v486_v51 = vld [vmem:[#allocation4 + $0x9] sm:$0xff]  ;;  %v1275_v20 = vsel %vm500_vm5, %v2472_v16, 0 }
 0x109   : > { %476 = vst.msk [vmem:[#allocation4 + $0x12] sm:$0x1] %vm295_vm6, %v474_v49  ;;  %v498_v54 = vsel %vm278_vm2, %v486_v51, 0  ;;  %v3054_v25 = vand.u32 4294901760, %v1275_v20  ;;  %v788_v32 = vsub.f32 %v3035_v11, %v787_v23  ;;  %v3102_v49 = vand.u32 4294901760, %v2469_v36  ;;  %v2467_v51 = vld [vmem:[%s3694_s0 + $0x90] sm:$0xff] }
 0x10a   : > { %v2998_v57 = vand.u32 4294901760, %v498_v54  ;;  %v3124_v1 = vand.u32 4294901760, %v2467_v51  ;;  %v1352_v16 = vand.u32 4294901760, %v3134_v6 }
 0x10b   : > { %v3079_v34 = vsub.f32 %v1275_v20, %v3054_v25  ;;  %v789_v40 = vand.u32 4294901760, %v788_v32 }
 0x10c   : > { %594 = vmatmul.f32.gmra.mxu1 %v2998_v57  ;;  %v535_v62 = vsub.f32 %v498_v54, %v2998_v57  ;;  %v1334_v54 = vand.u32 4294901760, %v3092_v39 }
 0x10d   : > { %v1328_v48 = vand.u32 4294901760, %v3079_v34 }
 0x10e   : > { %633 = vmatmul.f32.gmra.mxu2 %v535_v62  ;;  %v536_v4 = vand.u32 4294901760, %v535_v62 }
 0x10f   : > { %v1329_v59 = vsub.f32 %v3079_v34, %v1328_v48 }
 0x110   : > { %668 = vmatmul.f32.gmra.mxu3 %v536_v4  ;;  %v537_v9 = vsub.f32 %v535_v62, %v536_v4  ;;  %v3122_v62 = vsub.f32 %v2469_v36, %v3102_v49  ;;  %v1335_v4 = vsub.f32 %v3092_v39, %v1334_v54 }
 0x111   : > { %v1330_v10 = vand.u32 4294901760, %v1329_v59 }
 0x112   : > { %v538_v14 = vand.u32 4294901760, %v537_v9  ;;  %v997_v9 = vld [vmem:[#allocation4 + $0x2] sm:$0xff]  ;;  %v1336_v15 = vand.u32 4294901760, %v1335_v4 }
 0x114   : > { %539 = vmatmul.f32.gmra.mxu0 %v538_v14  ;;  %738 = vmatmul.f32.vlgmr.msrb.gmra.mxu1 %v2933_v22  ;;  %v3143_v14 = vsub.f32 %v2467_v51, %v3124_v1 }
 0x115   : > { %1069 = vmatpush.msrb.mxu1 %v1068_v12  ;;  %v1346_v12 = vand.u32 4294901760, %v3122_v62 }
 0x116   : > { %782 = vmatmul.f32.vlgmr.msrb.gmra.mxu2 %v781_v21 }
 0x117   : > { %1121 = vmatpush.msrb.mxu2 %v2978_v45  ;;  %1075 = vmatpush.msrb.mxu1 %v1074_v17  ;;  %v1358_v17 = vand.u32 4294901760, %v3143_v14 }
 0x118   : > { %841 = vmatmul.f32.vlgmr.msrb.gmra.mxu3 %v2974_v44 }
 0x119   : > { %1159 = vmatpush.msrb.mxu3 %v2963_v41  ;;  %1124 = vmatpush.msrb.mxu2 %v2984_v50  ;;  %v1359_v26 = vsub.f32 %v3143_v14, %v1358_v17  ;;  %v2477_v50 = vld [vmem:[%s3694_s0 + $0xe0] sm:$0xff] }
 0x11a   : > { %1081 = vmatpush.msrb.mxu1 %v1080_v27  ;;  %v3210_v36 = vand.u32 4294901760, %v2477_v50 }
 0x11b   : > { %1161 = vmatpush.msrb.mxu3 %v2969_v42  ;;  %1127 = vmatpush.msrb.mxu2 %v3001_v58  ;;  %v1360_v32 = vand.u32 4294901760, %v1359_v26 }
 0x11c   : > { %707 = vmatmul.f32.vlgmr.msrb.gmra.mxu0 %v2933_v22  ;;  %742 = vmatmul.f32.gmra.mxu1 %v2998_v57  ;;  %v3106_v22 = vsub.f32 %v2470_v31, %v3081_v35 }
 0x11d   : > { %1026 = vmatpush.msrb.mxu0 %v2963_v41  ;;  %1130 = vmatpush.msrb.mxu2 %v3027_v7 }
 0x11e   : > { %790 = vmatmul.f32.gmra.mxu2 %v789_v40  ;;  %1163 = vmatpush.msrb.mxu3 %v2981_v47  ;;  %v1340_v2 = vand.u32 4294901760, %v3106_v22 }
 0x11f   : > { %1028 = vmatpush.msrb.mxu0 %v2969_v42  ;;  %1087 = vmatpush.msrb.mxu1 %v1086_v37 }
 0x120   : > { %845 = vmatmul.f32.gmra.mxu3 %v3012_v0  ;;  %1133 = vmatpush.msrb.mxu2 %v3038_v13 }
 0x121   : > { %1165 = vmatpush.msrb.mxu3 %v3007_v61  ;;  %1093 = vmatpush.msrb.mxu1 %v1092_v46 }
 0x122   : > { %1030 = vmatpush.msrb.mxu0 %v2981_v47  ;;  %1136 = vmatpush.msrb.mxu2 %v3048_v19 }
 0x123   : > { %1099 = vmatpush.msrb.mxu1 %v1098_v53  ;;  %1167 = vmatpush.msrb.mxu3 %v3020_v3  ;;  %v2473_v53 = vld [vmem:[%s3694_s0 + $0xc0] sm:$0xff] }
 0x124   : > { %711 = vmatmul.f32.gmra.mxu0 %v2998_v57  ;;  %913 = vmatmul.f32.vlgmr.msra.gmra.mxu1 %v779_v63  ;;  %v1341_v57 = vsub.f32 %v3106_v22, %v1340_v2  ;;  %v1007_v63 = vsel %vm278_vm2, %v997_v9, 0  ;;  %v3277_v4 = vand.u32 4294901760, %v2473_v53 }
 0x125   : > { %1032 = vmatpush.msrb.mxu0 %v3007_v61  ;;  %1169 = vmatpush.msrb.mxu3 %v3029_v8  ;;  %v3161_v20 = vand.u32 4294901760, %v1007_v63 }
 0x126   : > { %958 = vmatmul.f32.vlgmr.msra.gmra.mxu2 %v2974_v44  ;;  %1237 = vmatpush.msra.mxu1 %v2963_v41  ;;  %v1347_v41 = vsub.f32 %v3122_v62, %v1346_v12  ;;  %v1342_v21 = vand.u32 4294901760, %v1341_v57 }
 0x127   : > { %1288 = vmatpush.msra.mxu2 %v3054_v25  ;;  %1034 = vmatpush.msrb.mxu0 %v3020_v3  ;;  %v1038_v27 = vsub.f32 %v1007_v63, %v3161_v20 }
 0x128   : > { %989 = vmatmul.f32.vlgmr.msra.gmra.mxu3 %v2974_v44  ;;  %1239 = vmatpush.msra.mxu1 %v2969_v42  ;;  %v1353_v42 = vsub.f32 %v3134_v6, %v1352_v16  ;;  %v998_v44 = vld [vmem:[#allocation4 + $0xa] sm:$0xff] }
 0x129   : > { %1331 = vmatpush.msra.mxu3 %v1330_v10  ;;  %1290 = vmatpush.msra.mxu2 %v3064_v30  ;;  %v1010_v45 = vsel %vm278_vm2, %v998_v44, 0  ;;  %v2483_v44 = vld [vmem:[%s3694_s0 + $0x110] sm:$0xff] }
 0x12a   : > { %1036 = vmatpush.msrb.mxu0 %v3029_v8  ;;  %1241 = vmatpush.msra.mxu1 %v2981_v47  ;;  %v1348_v47 = vand.u32 4294901760, %v1347_v41  ;;  %v3195_v33 = vand.u32 4294901760, %v1010_v45  ;;  %v3327_v26 = vand.u32 4294901760, %v2483_v44 }
 0x12b   : > { %1337 = vmatpush.msra.mxu3 %v1336_v15  ;;  %1292 = vmatpush.msra.mxu2 %v3081_v35 }
 0x12c   : > { %879 = vmatmul.f32.vlgmr.msra.gmra.mxu0 %v2989_v52  ;;  %919 = vmatmul.f32.gmra.mxu1 %v787_v23  ;;  %v1259_v52 = vld [vmem:[#allocation4 + $0x3] sm:$0xff] }
 0x12d   : > { %1196 = vmatpush.msra.mxu0 %v1066_v56  ;;  %1294 = vmatpush.msra.mxu2 %v3102_v49  ;;  %v2478_v23 = vld [vmem:[%s3694_s0 + $0xe8] sm:$0xf]  ;;  %v1354_v56 = vand.u32 4294901760, %v1353_v42  ;;  %v1269_v31 = vsel %vm278_vm2, %v1259_v52, 0 }
 0x12e   : > { %962 = vmatmul.f32.gmra.mxu2 %v3012_v0  ;;  %1343 = vmatpush.msra.mxu3 %v1342_v21  ;;  %v1537_v28 = vsel %vm500_vm5, %v2478_v23, 0 }
 0x12f   : > { %1200 = vmatpush.msra.mxu0 %v1072_v60  ;;  %1243 = vmatpush.msra.mxu1 %v3007_v61  ;;  %v1039_v60 = vand.u32 4294901760, %v1038_v27  ;;  %v3200_v61 = vand.u32 4294901760, %v1537_v28 }
 0x130   : > { %993 = vmatmul.f32.gmra.mxu3 %v3012_v0  ;;  %1296 = vmatpush.msra.mxu2 %v3113_v55  ;;  %v2476_v0 = vld [vmem:[%s3694_s0 + $0xd8] sm:$0xff] }
 0x131   : > { %1349 = vmatpush.msra.mxu3 %v1348_v47  ;;  %1245 = vmatpush.msra.mxu1 %v3020_v3  ;;  %v3208_v3 = vand.u32 4294901760, %v1269_v31  ;;  %v1040_v58 = vsub.f32 %v1038_v27, %v1039_v60  ;;  %v3217_v37 = vsub.f32 %v1537_v28, %v3200_v61 }
 0x132   : > { %1204 = vmatpush.msra.mxu0 %v1078_v5  ;;  %1298 = vmatpush.msra.mxu2 %v3124_v1  ;;  %v1046_v5 = vsub.f32 %v1010_v45, %v3195_v33 }
 0x133   : > { %1247 = vmatpush.msra.mxu1 %v3029_v8  ;;  %1355 = vmatpush.msra.mxu3 %v1354_v56  ;;  %v1260_v8 = vld [vmem:[#allocation4 + $0xb] sm:$0xff]  ;;  %v3226_v7 = vsub.f32 %v1269_v31, %v3208_v3  ;;  %v1590_v43 = vand.u32 4294901760, %v3217_v37  ;;  %v2481_v56 = vld [vmem:[%s3694_s0 + $0x100] sm:$0xff] }
 0x134   : > { %884 = vmatmul.f32.gmra.mxu0 %v3035_v11  ;;  %1101 = vmatmul.f32.vlgmr.msrb.gmra.mxu1 %v3161_v20  ;;  %v3219_v11 = vand.u32 4294901760, %v2476_v0  ;;  %v1272_v13 = vsel %vm278_vm2, %v1260_v8, 0  ;;  %v1047_v40 = vand.u32 4294901760, %v1046_v5 }
 0x135   : > { %1208 = vmatpush.msra.mxu0 %v1084_v18  ;;  %1361 = vmatpush.msra.mxu3 %v1360_v32  ;;  %v3230_v18 = vsub.f32 %v2477_v50, %v3210_v36  ;;  %v1301_v19 = vand.u32 4294901760, %v3226_v7  ;;  %v1591_v59 = vsub.f32 %v3217_v37, %v1590_v43  ;;  %v3356_v32 = vsub.f32 %v2483_v44, %v3327_v26  ;;  %v2480_v50 = vld [vmem:[%s3694_s0 + $0xf8] sm:$0xff] }
 0x136   : > { %1139 = vmatmul.f32.vlgmr.msrb.gmra.mxu2 %v1038_v27  ;;  %1421 = vmatpush.msrb.mxu1 %v3054_v25  ;;  %v3244_v46 = vsub.f32 %v2476_v0, %v3219_v11  ;;  %v2482_v27 = vld [vmem:[%s3694_s0 + $0x108] sm:$0xff] }
 0x137   : > { %1458 = vmatpush.msrb.mxu2 %v1328_v48  ;;  %1212 = vmatpush.msra.mxu0 %v1090_v24  ;;  %v1041_v24 = vand.u32 4294901760, %v1040_v58  ;;  %v3252_v48 = vand.u32 4294901760, %v2475_v38  ;;  %v1596_v51 = vand.u32 4294901760, %v3230_v18  ;;  %v1592_v57 = vand.u32 4294901760, %v1591_v59 }
 0x138   : > { %1173 = vmatmul.f32.vlgmr.msrb.gmra.mxu3 %v1039_v60  ;;  %1423 = vmatpush.msrb.mxu1 %v3064_v30  ;;  %v3345_v45 = vand.u32 4294901760, %v2482_v27  ;;  %v3366_v58 = vand.u32 4294901760, %v2481_v56 }
 0x139   : > { %1499 = vmatpush.msrb.mxu3 %v3054_v25  ;;  %1462 = vmatpush.msrb.mxu2 %v1334_v54  ;;  %v2474_v25 = vld [vmem:[%s3694_s0 + $0xc8] sm:$0xff]  ;;  %v1048_v54 = vsub.f32 %v1046_v5, %v1047_v40 }
 0x13a   : > { %1216 = vmatpush.msra.mxu0 %v1096_v29  ;;  %1425 = vmatpush.msrb.mxu1 %v3081_v35  ;;  %v3256_v29 = vand.u32 4294901760, %v1272_v13 }
 0x13b   : > { %1501 = vmatpush.msrb.mxu3 %v3064_v30  ;;  %1466 = vmatpush.msrb.mxu2 %v1340_v2  ;;  %v3265_v30 = vand.u32 4294901760, %v2474_v25  ;;  %v1602_v2 = vand.u32 4294901760, %v3244_v46 }
 0x13c   : > { %1042 = vmatmul.f32.vlgmr.msrb.gmra.mxu0 %v1041_v24  ;;  %1105 = vmatmul.f32.gmra.mxu1 %v3195_v33  ;;  %v3283_v9 = vsub.f32 %v1272_v13, %v3256_v29  ;;  %v3377_v13 = vand.u32 4294901760, %v2480_v50 }
 0x13d   : > { %1383 = vmatpush.msrb.mxu0 %v3079_v34  ;;  %1470 = vmatpush.msrb.mxu2 %v1346_v12  ;;  %v3275_v34 = vsub.f32 %v2475_v38, %v3252_v48  ;;  %v3293_v10 = vsub.f32 %v2474_v25, %v3265_v30  ;;  %v1049_v12 = vand.u32 4294901760, %v1048_v54  ;;  %v1603_v63 = vsub.f32 %v3244_v46, %v1602_v2 }
 0x13e   : > { %1144 = vmatmul.f32.gmra.mxu2 %v1046_v5  ;;  %1503 = vmatpush.msrb.mxu3 %v3081_v35  ;;  %v1302_v35 = vsub.f32 %v3226_v7, %v1301_v19  ;;  %v2479_v5 = vld [vmem:[%s3694_s0 + $0xf0] sm:$0xff]  ;;  %v1858_v38 = vand.u32 4294901760, %v3356_v32  ;;  %v3398_v59 = vsub.f32 %v2480_v50, %v3377_v13 }
 0x13f   : > { %1386 = vmatpush.msrb.mxu0 %v3092_v39  ;;  %1427 = vmatpush.msrb.mxu1 %v3102_v49  ;;  %v1597_v39 = vsub.f32 %v3230_v18, %v1596_v51  ;;  %v1608_v15 = vand.u32 4294901760, %v3275_v34  ;;  %v1604_v47 = vand.u32 4294901760, %v1603_v63  ;;  %v3388_v25 = vand.u32 4294901760, %v2479_v5 }
 0x140   : > { %1179 = vmatmul.f32.gmra.mxu3 %v1047_v40  ;;  %1474 = vmatpush.msrb.mxu2 %v1352_v16  ;;  %v1303_v41 = vand.u32 4294901760, %v1302_v35  ;;  %v3386_v40 = vsub.f32 %v2481_v56, %v3366_v58  ;;  %v1859_v54 = vsub.f32 %v3356_v32, %v1858_v38  ;;  %v1521_v35 = vld [vmem:[#allocation4 + $0x4] sm:$0xff] }
 0x141   : > { %1505 = vmatpush.msrb.mxu3 %v3102_v49  ;;  %1429 = vmatpush.msrb.mxu1 %v3113_v55  ;;  %v2484_v49 = vld [vmem:[%s3694_s0 + $0x118] sm:$0xf]  ;;  %v1598_v21 = vand.u32 4294901760, %v1597_v39 }
 0x142   : > { %1389 = vmatpush.msrb.mxu0 %v3106_v22  ;;  %1478 = vmatpush.msrb.mxu2 %v1358_v17  ;;  %v3308_v22 = vsub.f32 %v2473_v53, %v3277_v4  ;;  %v1799_v16 = vsel %vm500_vm5, %v2484_v49, 0  ;;  %v1309_v17 = vand.u32 4294901760, %v3283_v9  ;;  %v1860_v63 = vand.u32 4294901760, %v1859_v54 }
 0x143   : > { %1431 = vmatpush.msrb.mxu1 %v3124_v1  ;;  %1507 = vmatpush.msrb.mxu3 %v3113_v55  ;;  %v1614_v55 = vand.u32 4294901760, %v3293_v10  ;;  %v3316_v42 = vand.u32 4294901760, %v1799_v16  ;;  %v1876_v49 = vand.u32 4294901760, %v3398_v59 }
 0x144   : > { %1050 = vmatmul.f32.gmra.mxu0 %v1049_v12  ;;  %1249 = vmatmul.f32.vlgmr.msra.gmra.mxu1 %v3161_v20  ;;  %v1310_v52 = vsub.f32 %v3283_v9, %v1309_v17  ;;  %v1870_v12 = vand.u32 4294901760, %v3386_v40 }
 0x145   : > { %1392 = vmatpush.msrb.mxu0 %v3122_v62  ;;  %1509 = vmatpush.msrb.mxu3 %v3124_v1  ;;  %v1609_v62 = vsub.f32 %v3275_v34, %v1608_v15  ;;  %v1620_v1 = vand.u32 4294901760, %v3308_v22  ;;  %v3342_v23 = vsub.f32 %v1799_v16, %v3316_v42 }
 0x146   : > { %1304 = vmatmul.f32.vlgmr.msra.gmra.mxu2 %v1303_v41  ;;  %1593 = vmatpush.msra.mxu1 %v1592_v57  ;;  %v3407_v57 = vsub.f32 %v2479_v5, %v3388_v25 }
 0x147   : > { %1645 = vmatpush.msra.mxu2 %v3217_v37  ;;  %1395 = vmatpush.msrb.mxu0 %v3134_v6  ;;  %v1615_v6 = vsub.f32 %v3293_v10, %v1614_v55  ;;  %v1610_v28 = vand.u32 4294901760, %v1609_v62  ;;  %v1621_v31 = vsub.f32 %v3308_v22, %v1620_v1  ;;  %v1852_v0 = vand.u32 4294901760, %v3342_v23 }
 0x148   : > { %1363 = vmatmul.f32.vlgmr.msra.gmra.mxu3 %v3208_v3  ;;  %1599 = vmatpush.msra.mxu1 %v1598_v21  ;;  %v1882_v16 = vand.u32 4294901760, %v3407_v57 }
 0x149   : > { %1683 = vmatpush.msra.mxu3 %v3200_v61  ;;  %1648 = vmatpush.msra.mxu2 %v3230_v18  ;;  %v1616_v60 = vand.u32 4294901760, %v1615_v6  ;;  %v1622_v8 = vand.u32 4294901760, %v1621_v31  ;;  %v1853_v24 = vsub.f32 %v3342_v23, %v1852_v0  ;;  %v2489_v18 = vld [vmem:[%s3694_s0 + $0x140] sm:$0xff]  ;;  %v2487_v31 = vld [vmem:[%s3694_s0 + $0x130] sm:$0xff] }
 0x14a   : > { %1398 = vmatpush.msrb.mxu0 %v3143_v14  ;;  %1605 = vmatpush.msra.mxu1 %v1604_v47  ;;  %v1311_v14 = vand.u32 4294901760, %v1310_v52  ;;  %v1883_v44 = vsub.f32 %v3407_v57, %v1882_v16  ;;  %v3474_v56 = vand.u32 4294901760, %v2489_v18 }
 0x14b   : > { %1685 = vmatpush.msra.mxu3 %v3210_v36  ;;  %1651 = vmatpush.msra.mxu2 %v3244_v46  ;;  %v1854_v39 = vand.u32 4294901760, %v1853_v24 }
 0x14c   : > { %1218 = vmatmul.f32.vlgmr.msra.gmra.mxu0 %v3161_v20  ;;  %1253 = vmatmul.f32.gmra.mxu1 %v3195_v33  ;;  %v3370_v20 = vsub.f32 %v2482_v27, %v3345_v45  ;;  %v1884_v52 = vand.u32 4294901760, %v1883_v44 }
 0x14d   : > { %1550 = vmatpush.msra.mxu0 %v3200_v61  ;;  %1654 = vmatpush.msra.mxu2 %v3275_v34 }
 0x14e   : > { %1312 = vmatmul.f32.gmra.mxu2 %v1311_v14  ;;  %1687 = vmatpush.msra.mxu3 %v3219_v11  ;;  %v1864_v53 = vand.u32 4294901760, %v3370_v20 }
 0x14f   : > { %1552 = vmatpush.msra.mxu0 %v3210_v36  ;;  %1611 = vmatpush.msra.mxu1 %v1610_v28 }
 0x150   : > { %1367 = vmatmul.f32.gmra.mxu3 %v3256_v29  ;;  %1657 = vmatpush.msra.mxu2 %v3293_v10 }
 0x151   : > { %1689 = vmatpush.msra.mxu3 %v3252_v48  ;;  %1617 = vmatpush.msra.mxu1 %v1616_v60 }
 0x152   : > { %1554 = vmatpush.msra.mxu0 %v3219_v11  ;;  %1660 = vmatpush.msra.mxu2 %v3308_v22 }
 0x153   : > { %1623 = vmatpush.msra.mxu1 %v1622_v8  ;;  %1691 = vmatpush.msra.mxu3 %v3265_v30  ;;  %v2485_v8 = vld [vmem:[%s3694_s0 + $0x120] sm:$0xff] }
 0x154   : > { %1222 = vmatmul.f32.gmra.mxu0 %v3195_v33  ;;  %1435 = vmatmul.f32.vlgmr.msrb.gmra.mxu1 %v1301_v19  ;;  %v1865_v33 = vsub.f32 %v3370_v20, %v1864_v53  ;;  %v1531_v19 = vsel %vm278_vm2, %v1521_v35, 0  ;;  %v3544_v54 = vand.u32 4294901760, %v2485_v8 }
 0x155   : > { %1556 = vmatpush.msra.mxu0 %v3252_v48  ;;  %1693 = vmatpush.msra.mxu3 %v3277_v4  ;;  %v3425_v41 = vand.u32 4294901760, %v1531_v19 }
 0x156   : > { %1480 = vmatmul.f32.vlgmr.msrb.gmra.mxu2 %v3208_v3  ;;  %1761 = vmatpush.msrb.mxu1 %v3200_v61  ;;  %v1871_v61 = vsub.f32 %v3386_v40, %v1870_v12  ;;  %v1866_v21 = vand.u32 4294901760, %v1865_v33 }
 0x157   : > { %1812 = vmatpush.msrb.mxu2 %v3316_v42  ;;  %1558 = vmatpush.msra.mxu0 %v3265_v30  ;;  %v1562_v47 = vsub.f32 %v1531_v19, %v3425_v41 }
 0x158   : > { %1511 = vmatmul.f32.vlgmr.msrb.gmra.mxu3 %v3208_v3  ;;  %1763 = vmatpush.msrb.mxu1 %v3210_v36  ;;  %v1877_v3 = vsub.f32 %v3398_v59, %v1876_v49  ;;  %v1522_v36 = vld [vmem:[#allocation4 + $0xc] sm:$0xff] }
 0x159   : > { %1855 = vmatpush.msrb.mxu3 %v1854_v39  ;;  %1814 = vmatpush.msrb.mxu2 %v3327_v26  ;;  %v1534_v37 = vsel %vm278_vm2, %v1522_v36, 0 }
 0x15a   : > { %1560 = vmatpush.msra.mxu0 %v3277_v4  ;;  %1765 = vmatpush.msrb.mxu1 %v3219_v11  ;;  %v1872_v11 = vand.u32 4294901760, %v1871_v61  ;;  %v3459_v6 = vand.u32 4294901760, %v1534_v37 }
 0x15b   : > { %1861 = vmatpush.msrb.mxu3 %v1860_v63  ;;  %1816 = vmatpush.msrb.mxu2 %v3345_v45 }
 0x15c   : > { %1401 = vmatmul.f32.vlgmr.msrb.gmra.mxu0 %v3226_v7  ;;  %1441 = vmatmul.f32.gmra.mxu1 %v1309_v17  ;;  %v1783_v7 = vld [vmem:[#allocation4 + $0x5] sm:$0xff]  ;;  %v2490_v17 = vld [vmem:[%s3694_s0 + $0x148] sm:$0xf] }
 0x15d   : > { %1720 = vmatpush.msrb.mxu0 %v1590_v43  ;;  %1818 = vmatpush.msrb.mxu2 %v3366_v58  ;;  %v1878_v43 = vand.u32 4294901760, %v1877_v3  ;;  %v2061_v62 = vsel %vm500_vm5, %v2490_v17, 0  ;;  %v1793_v27 = vsel %vm278_vm2, %v1783_v7, 0 }
 0x15e   : > { %1484 = vmatmul.f32.gmra.mxu2 %v3256_v29  ;;  %1867 = vmatpush.msrb.mxu3 %v1866_v21 }
 0x15f   : > { %1724 = vmatpush.msrb.mxu0 %v1596_v51  ;;  %1767 = vmatpush.msrb.mxu1 %v3252_v48  ;;  %v1563_v51 = vand.u32 4294901760, %v1562_v47  ;;  %v3464_v48 = vand.u32 4294901760, %v2061_v62 }
 0x160   : > { %1515 = vmatmul.f32.gmra.mxu3 %v3256_v29  ;;  %1820 = vmatpush.msrb.mxu2 %v3377_v13  ;;  %v2488_v29 = vld [vmem:[%s3694_s0 + $0x138] sm:$0xff] }
 0x161   : > { %1873 = vmatpush.msrb.mxu3 %v1872_v11  ;;  %1769 = vmatpush.msrb.mxu1 %v3265_v30  ;;  %v3472_v30 = vand.u32 4294901760, %v1793_v27  ;;  %v1564_v46 = vsub.f32 %v1562_v47, %v1563_v51  ;;  %v3481_v28 = vsub.f32 %v2061_v62, %v3464_v48 }
 0x162   : > { %1728 = vmatpush.msrb.mxu0 %v1602_v2  ;;  %1822 = vmatpush.msrb.mxu2 %v3388_v25  ;;  %v1570_v2 = vsub.f32 %v1534_v37, %v3459_v6 }
 0x163   : > { %1771 = vmatpush.msrb.mxu1 %v3277_v4  ;;  %1879 = vmatpush.msrb.mxu3 %v1878_v43  ;;  %v1784_v4 = vld [vmem:[#allocation4 + $0xd] sm:$0xff]  ;;  %v3490_v34 = vsub.f32 %v1793_v27, %v3472_v30  ;;  %v3507_v50 = vand.u32 4294901760, %v3481_v28 }
 0x164   : > { %1406 = vmatmul.f32.gmra.mxu0 %v3283_v9  ;;  %1625 = vmatmul.f32.vlgmr.msra.gmra.mxu1 %v3425_v41  ;;  %v3483_v9 = vand.u32 4294901760, %v2488_v29  ;;  %v1796_v10 = vsel %vm278_vm2, %v1784_v4, 0  ;;  %v1571_v14 = vand.u32 4294901760, %v1570_v2 }
 0x165   : > { %1732 = vmatpush.msrb.mxu0 %v1608_v15  ;;  %1885 = vmatpush.msrb.mxu3 %v1884_v52  ;;  %v3494_v15 = vsub.f32 %v2489_v18, %v3474_v56  ;;  %v1825_v22 = vand.u32 4294901760, %v3490_v34  ;;  %v2115_v24 = vsub.f32 %v3481_v28, %v3507_v50 }
 0x166   : > { %1663 = vmatmul.f32.vlgmr.msra.gmra.mxu2 %v1562_v47  ;;  %1945 = vmatpush.msra.mxu1 %v3316_v42  ;;  %v3510_v60 = vsub.f32 %v2488_v29, %v3483_v9 }
 0x167   : > { %1982 = vmatpush.msra.mxu2 %v1852_v0  ;;  %1736 = vmatpush.msrb.mxu0 %v1614_v55  ;;  %v1565_v55 = vand.u32 4294901760, %v1564_v46  ;;  %v3518_v0 = vand.u32 4294901760, %v2487_v31  ;;  %v3525_v5 = vand.u32 4294901760, %v3494_v15  ;;  %v1826_v35 = vsub.f32 %v3490_v34, %v1825_v22 }
 0x168   : > { %1697 = vmatmul.f32.vlgmr.msra.gmra.mxu3 %v1563_v51  ;;  %1947 = vmatpush.msra.mxu1 %v3327_v26  ;;  %v2116_v33 = vand.u32 4294901760, %v2115_v24 }
 0x169   : > { %2023 = vmatpush.msra.mxu3 %v3316_v42  ;;  %1986 = vmatpush.msra.mxu2 %v1858_v38  ;;  %v2486_v42 = vld [vmem:[%s3694_s0 + $0x128] sm:$0xff]  ;;  %v1572_v38 = vsub.f32 %v1570_v2, %v1571_v14 }
 0x16a   : > { %1740 = vmatpush.msrb.mxu0 %v1620_v1  ;;  %1949 = vmatpush.msra.mxu1 %v3345_v45  ;;  %v3522_v1 = vand.u32 4294901760, %v1796_v10 }
 0x16b   : > { %2025 = vmatpush.msra.mxu3 %v3327_v26  ;;  %1990 = vmatpush.msra.mxu2 %v1864_v53  ;;  %v3533_v26 = vand.u32 4294901760, %v2486_v42  ;;  %v3539_v53 = vand.u32 4294901760, %v3510_v60 }
 0x16c   : > { %1566 = vmatmul.f32.vlgmr.msra.gmra.mxu0 %v1565_v55  ;;  %1629 = vmatmul.f32.gmra.mxu1 %v3459_v6 }
 0x16d   : > { %1907 = vmatpush.msra.mxu0 %v3342_v23  ;;  %1994 = vmatpush.msra.mxu2 %v1870_v12  ;;  %v2131_v23 = vsub.f32 %v2487_v31, %v3518_v0  ;;  %v2137_v39 = vsub.f32 %v2486_v42, %v3533_v26  ;;  %v1573_v12 = vand.u32 4294901760, %v1572_v38  ;;  %v2127_v19 = vsub.f32 %v3510_v60, %v3539_v53 }
 0x16e   : > { %1668 = vmatmul.f32.gmra.mxu2 %v1570_v2  ;;  %2027 = vmatpush.msra.mxu3 %v3345_v45  ;;  %v3550_v45 = vsub.f32 %v1796_v10, %v3522_v1 }
 0x16f   : > { %1910 = vmatpush.msra.mxu0 %v3356_v32  ;;  %1951 = vmatpush.msra.mxu1 %v3366_v58  ;;  %v2121_v32 = vsub.f32 %v3494_v15, %v3525_v5  ;;  %v3566_v63 = vand.u32 4294901760, %v2131_v23 }
 0x170   : > { %1703 = vmatmul.f32.gmra.mxu3 %v1571_v14  ;;  %1998 = vmatpush.msra.mxu2 %v1876_v49  ;;  %v1827_v49 = vand.u32 4294901760, %v1826_v35 }
 0x171   : > { %2029 = vmatpush.msra.mxu3 %v3366_v58  ;;  %1953 = vmatpush.msra.mxu1 %v3377_v13  ;;  %v2143_v58 = vsub.f32 %v2485_v8, %v3544_v54  ;;  %v2122_v61 = vand.u32 4294901760, %v2121_v32  ;;  %v2133_v21 = vsub.f32 %v2131_v23, %v3566_v63 }
 0x172   : > { %1913 = vmatpush.msra.mxu0 %v3370_v20  ;;  %2002 = vmatpush.msra.mxu2 %v1882_v16  ;;  %v1833_v20 = vand.u32 4294901760, %v3550_v45  ;;  %v3573_v16 = vand.u32 4294901760, %v2137_v39 }
 0x173   : > { %1955 = vmatpush.msra.mxu1 %v3388_v25  ;;  %2031 = vmatpush.msra.mxu3 %v3377_v13  ;;  %v2128_v13 = vand.u32 4294901760, %v2127_v19  ;;  %v3578_v3 = vand.u32 4294901760, %v2143_v58  ;;  %v2134_v47 = vand.u32 4294901760, %v2133_v21 }
 0x174   : > { %1574 = vmatmul.f32.gmra.mxu0 %v1573_v12  ;;  %1773 = vmatmul.f32.vlgmr.msrb.gmra.mxu1 %v3425_v41  ;;  %v2139_v11 = vsub.f32 %v2137_v39, %v3573_v16 }
 0x175   : > { %1916 = vmatpush.msra.mxu0 %v3386_v40  ;;  %2033 = vmatpush.msra.mxu3 %v3388_v25  ;;  %v1834_v40 = vsub.f32 %v3550_v45, %v1833_v20  ;;  %v591_v25 = vpop.f32.mrf.mxu1  ;;  %v2145_v7 = vsub.f32 %v2143_v58, %v3578_v3 }
 0x176   : > { %1828 = vmatmul.f32.vlgmr.msrb.gmra.mxu2 %v1827_v49  ;;  %2117 = vmatpush.msrb.mxu1 %v2116_v33 }
 0x177   : > { %2169 = vmatpush.msrb.mxu2 %v3481_v28  ;;  %1919 = vmatpush.msra.mxu0 %v3398_v59  ;;  %v1835_v37 = vand.u32 4294901760, %v1834_v40  ;;  %v2146_v27 = vand.u32 4294901760, %v2145_v7 }
 0x178   : > { %1887 = vmatmul.f32.vlgmr.msrb.gmra.mxu3 %v3472_v30  ;;  %2123 = vmatpush.msrb.mxu1 %v2122_v61 }
 0x179   : > { %v532_v36 = vpop.f32.mrf.mxu0  ;;  %2207 = vmatpush.msrb.mxu3 %v3464_v48  ;;  %2172 = vmatpush.msrb.mxu2 %v3494_v15  ;;  %v629_v44 = vpop.f32.mrf.mxu2 }
 0x17a   : > { %v592_v59 = vadd.f32 %v591_v25, %v532_v36  ;;  %1922 = vmatpush.msra.mxu0 %v3407_v57  ;;  %2129 = vmatpush.msrb.mxu1 %v2128_v13  ;;  %v2140_v57 = vand.u32 4294901760, %v2139_v11 }
 0x17b   : > { %2209 = vmatpush.msrb.mxu3 %v3474_v56  ;;  %2175 = vmatpush.msrb.mxu2 %v3510_v60  ;;  %v663_v43 = vpop.f32.mrf.mxu3 }
 0x17c   : > { %v630_v17 = vadd.f32 %v629_v44, %v592_v59  ;;  %1742 = vmatmul.f32.vlgmr.msrb.gmra.mxu0 %v3425_v41  ;;  %1777 = vmatmul.f32.gmra.mxu1 %v3459_v6  ;;  %v2045_v41 = vld [vmem:[#allocation4 + $0x6] sm:$0xff] }
 0x17d   : > { %2074 = vmatpush.msrb.mxu0 %v3464_v48  ;;  %2178 = vmatpush.msrb.mxu2 %v2131_v23  ;;  %v2055_v52 = vsel %vm278_vm2, %v2045_v41, 0 }
 0x17e   : > { %v3594_v62 = vadd.f32 %v663_v43, %v630_v17  ;;  %1836 = vmatmul.f32.gmra.mxu2 %v1835_v37  ;;  %2211 = vmatpush.msrb.mxu3 %v3483_v9  ;;  %v3616_v51 = vand.u32 4294901760, %v2055_v52 }
 0x17f   : > { %2076 = vmatpush.msrb.mxu0 %v3474_v56  ;;  %2135 = vmatpush.msrb.mxu1 %v2134_v47 }
 0x180   : > { %1891 = vmatmul.f32.gmra.mxu3 %v3522_v1  ;;  %2181 = vmatpush.msrb.mxu2 %v2137_v39 }
 0x181   : > { %2213 = vmatpush.msrb.mxu3 %v3518_v0  ;;  %2141 = vmatpush.msrb.mxu1 %v2140_v57 }
 0x182   : > { %2078 = vmatpush.msrb.mxu0 %v3483_v9  ;;  %2184 = vmatpush.msrb.mxu2 %v2143_v58 }
 0x183   : > { %2147 = vmatpush.msrb.mxu1 %v2146_v27  ;;  %2215 = vmatpush.msrb.mxu3 %v3533_v26 }
 0x184   : > { %1746 = vmatmul.f32.gmra.mxu0 %v3459_v6  ;;  %1959 = vmatmul.f32.vlgmr.msra.gmra.mxu1 %v1825_v22  ;;  %v2046_v6 = vld [vmem:[#allocation4 + $0xe] sm:$0xff] }
 0x185   : > { %2080 = vmatpush.msrb.mxu0 %v3518_v0  ;;  %2217 = vmatpush.msrb.mxu3 %v3544_v54  ;;  %v2058_v29 = vsel %vm278_vm2, %v2046_v6, 0 }
 0x186   : > { %2004 = vmatmul.f32.vlgmr.msra.gmra.mxu2 %v3472_v30  ;;  %2285 = vmatpush.msra.mxu1 %v3464_v48  ;;  %v2093_v28 = vand.u32 4294901760, %v2058_v29 }
 0x187   : > { %2500 = vmatpush.msra.mxu2 %v3507_v50  ;;  %2082 = vmatpush.msrb.mxu0 %v3533_v26 }
 0x188   : > { %2035 = vmatmul.f32.vlgmr.msra.gmra.mxu3 %v3472_v30  ;;  %2287 = vmatpush.msra.mxu1 %v3474_v56  ;;  %v2094_v10 = vsub.f32 %v2058_v29, %v2093_v28 }
 0x189   : > { %v595_v18 = vpop.f32.mrf.mxu1  ;;  %2506 = vmatpush.msra.mxu3 %v3464_v48  ;;  %2501 = vmatpush.msra.mxu2 %v3525_v5  ;;  %v2086_v48 = vsub.f32 %v2055_v52, %v3616_v51 }
 0x18a   : > { %2084 = vmatpush.msrb.mxu0 %v3544_v54  ;;  %2289 = vmatpush.msra.mxu1 %v3483_v9 }
 0x18b   : > { %2507 = vmatpush.msra.mxu3 %v3474_v56  ;;  %2502 = vmatpush.msra.mxu2 %v3539_v53  ;;  %v2087_v4 = vand.u32 4294901760, %v2086_v48 }
 0x18c   : > { %1925 = vmatmul.f32.vlgmr.msra.gmra.mxu0 %v3490_v34  ;;  %1965 = vmatmul.f32.gmra.mxu1 %v1833_v20 }
 0x18d   : > { %2244 = vmatpush.msra.mxu0 %v3507_v50  ;;  %2503 = vmatpush.msra.mxu2 %v3566_v63  ;;  %v2088_v31 = vsub.f32 %v2086_v48, %v2087_v4 }
 0x18e   : > { %2008 = vmatmul.f32.gmra.mxu2 %v3522_v1  ;;  %2508 = vmatpush.msra.mxu3 %v3483_v9 }
 0x18f   : > { %2248 = vmatpush.msra.mxu0 %v3525_v5  ;;  %2291 = vmatpush.msra.mxu1 %v3518_v0  ;;  %v2089_v42 = vand.u32 4294901760, %v2088_v31 }
 0x190   : > { %2039 = vmatmul.f32.gmra.mxu3 %v3522_v1  ;;  %2504 = vmatpush.msra.mxu2 %v3573_v16 }
 0x191   : > { %v540_v30 = vpop.f32.mrf.mxu0  ;;  %v634_v56 = vpop.f32.mrf.mxu2  ;;  %2509 = vmatpush.msra.mxu3 %v3518_v0  ;;  %2293 = vmatpush.msra.mxu1 %v3533_v26  ;;  %v2095_v0 = vand.u32 4294901760, %v2094_v10 }
 0x192   : > { %v596_v46 = vadd.f32 %v595_v18, %v540_v30  ;;  %v739_v2 = vpop.f32.mrf.mxu1  ;;  %2252 = vmatpush.msra.mxu0 %v3539_v53  ;;  %2505 = vmatpush.msra.mxu2 %v3578_v3 }
 0x193   : > { %v669_v9 = vpop.f32.mrf.mxu3  ;;  %2510 = vmatpush.msra.mxu3 %v3533_v26  ;;  %2295 = vmatpush.msra.mxu1 %v3544_v54  ;;  %v2096_v8 = vsub.f32 %v2094_v10, %v2095_v0 }
 0x194   : > { %v635_v34 = vadd.f32 %v634_v56, %v596_v46  ;;  %1930 = vmatmul.f32.gmra.mxu0 %v3550_v45  ;;  %2149 = vmatmul.f32.vlgmr.msrb.gmra.mxu1 %v3616_v51 }
 0x195   : > { %2256 = vmatpush.msra.mxu0 %v3566_v63  ;;  %2511 = vmatpush.msra.mxu3 %v3544_v54  ;;  %v2097_v54 = vand.u32 4294901760, %v2096_v8 }
 0x196   : > { %v670_v15 = vadd.f32 %v669_v9, %v635_v34  ;;  %2187 = vmatmul.f32.vlgmr.msrb.gmra.mxu2 %v2086_v48 }
 0x197   : > { %2260 = vmatpush.msra.mxu0 %v3573_v16 }
 0x198   : > { %2221 = vmatmul.f32.vlgmr.msrb.gmra.mxu3 %v2087_v4 }
 0x199   : > { %v708_v55 = vpop.f32.mrf.mxu0  ;;  %v783_v14 = vpop.f32.mrf.mxu2  ;;  %2264 = vmatpush.msra.mxu0 %v3578_v3 }
 0x19a   : > { %v709_v50 = vadd.f32 %v708_v55, %v3594_v62  ;;  %v743_v60 = vpop.f32.mrf.mxu1 }
 0x19b   : > { %v842_v22 = vpop.f32.mrf.mxu3 }
 0x19c   : > { %v740_v1 = vadd.f32 %v739_v2, %v709_v50  ;;  %2090 = vmatmul.f32.vlgmr.msrb.gmra.mxu0 %v2089_v42  ;;  %2153 = vmatmul.f32.gmra.mxu1 %v2093_v28 }
 0x19e   : > { %v784_v5 = vadd.f32 %v783_v14, %v740_v1  ;;  %2192 = vmatmul.f32.gmra.mxu2 %v2094_v10 }
 0x1a0   : > { %v843_v26 = vadd.f32 %v842_v22, %v784_v5  ;;  %2227 = vmatmul.f32.gmra.mxu3 %v2095_v0 }
 0x1a1   : > { %v712_v38 = vpop.f32.mrf.mxu0  ;;  %v791_v24 = vpop.f32.mrf.mxu2 }
 0x1a2   : > { %v713_v53 = vadd.f32 %v712_v38, %v670_v15  ;;  %v914_v23 = vpop.f32.mrf.mxu1 }
 0x1a3   : > { %v846_v35 = vpop.f32.mrf.mxu3 }
 0x1a4   : > { %v744_v45 = vadd.f32 %v743_v60, %v713_v53  ;;  %2098 = vmatmul.f32.gmra.mxu0 %v2097_v54  ;;  %2297 = vmatmul.f32.vlgmr.msra.gmra.mxu1 %v3616_v51 }
 0x1a6   : > { %v792_v32 = vadd.f32 %v791_v24, %v744_v45  ;;  %2270 = vmatmul.f32.vlgmr.msra.gmra.mxu2 %v2093_v28 }
 0x1a8   : > { %v847_v39 = vadd.f32 %v846_v35, %v792_v32  ;;  %2301 = vmatmul.f32.vlgmr.msra.gmra.mxu3 %v2093_v28 }
 0x1a9   : > { %v880_v12 = vpop.f32.mrf.mxu0  ;;  %v959_v33 = vpop.f32.mrf.mxu2 }
 0x1aa   : > { %v881_v19 = vadd.f32 %v880_v12, %v843_v26  ;;  %v920_v63 = vpop.f32.mrf.mxu1 }
 0x1ab   : > { %v990_v58 = vpop.f32.mrf.mxu3 }
 0x1ac   : > { %v915_v49 = vadd.f32 %v914_v23, %v881_v19  ;;  %2266 = vmatmul.f32.vlgmr.msra.gmra.mxu0 %v3616_v51 }
 0x1ae   : > { %v960_v20 = vadd.f32 %v959_v33, %v915_v49 }
 0x1b0   : > { %v991_v61 = vadd.f32 %v990_v58, %v960_v20 }
 0x1b1   : > { %v885_v16 = vpop.f32.mrf.mxu0  ;;  %v963_v13 = vpop.f32.mrf.mxu2 }
 0x1b2   : > { %v886_v21 = vadd.f32 %v885_v16, %v847_v39  ;;  %v1102_v3 = vpop.f32.mrf.mxu1 }
 0x1b3   : > { %v994_v40 = vpop.f32.mrf.mxu3 }
 0x1b4   : > { %v921_v25 = vadd.f32 %v920_v63, %v886_v21 }
 0x1b6   : > { %v964_v36 = vadd.f32 %v963_v13, %v921_v25 }
 0x1b8   : > { %v995_v11 = vadd.f32 %v994_v40, %v964_v36 }
 0x1b9   : > { %v1043_v59 = vpop.f32.mrf.mxu0  ;;  %v1140_v44 = vpop.f32.mrf.mxu2 }
 0x1ba   : > { %v1103_v47 = vadd.f32 %v1102_v3, %v1043_v59  ;;  %v1106_v7 = vpop.f32.mrf.mxu1 }
 0x1bb   : > { %v1174_v17 = vpop.f32.mrf.mxu3 }
 0x1bc   : > { %v1141_v37 = vadd.f32 %v1140_v44, %v1103_v47 }
 0x1be   : > { %v1175_v43 = vadd.f32 %v1174_v17, %v1141_v37 }
 0x1c1   : > { %v1051_v57 = vpop.f32.mrf.mxu0  ;;  %v1145_v62 = vpop.f32.mrf.mxu2 }
 0x1c2   : > { %v1107_v27 = vadd.f32 %v1106_v7, %v1051_v57  ;;  %v1250_v41 = vpop.f32.mrf.mxu1 }
 0x1c3   : > { %v1180_v52 = vpop.f32.mrf.mxu3 }
 0x1c4   : > { %v1146_v18 = vadd.f32 %v1145_v62, %v1107_v27 }
 0x1c6   : > { %v1181_v51 = vadd.f32 %v1180_v52, %v1146_v18 }
 0x1c9   : > { %v1219_v6 = vpop.f32.mrf.mxu0  ;;  %v1305_v48 = vpop.f32.mrf.mxu2 }
 0x1ca   : > { %v1220_v29 = vadd.f32 %v1219_v6, %v1175_v43  ;;  %v1254_v30 = vpop.f32.mrf.mxu1 }
 0x1cb   : > { %v1364_v56 = vpop.f32.mrf.mxu3 }
 0x1cc   : > { %v1251_v46 = vadd.f32 %v1250_v41, %v1220_v29  ;;  %v1365_v2 = vadd.f32 %v1364_v56, %v1305_v48 }
 0x1ce   : > { %v1257_v4 = vadd.f32 %v1251_v46, %v991_v61 }
 0x1d1   : > { %v1223_v28 = vpop.f32.mrf.mxu0  ;;  %v1313_v9 = vpop.f32.mrf.mxu2 }
 0x1d2   : > { %v1224_v34 = vadd.f32 %v1223_v28, %v1181_v51  ;;  %v1436_v15 = vpop.f32.mrf.mxu1 }
 0x1d3   : > { %v1368_v31 = vpop.f32.mrf.mxu3 }
 0x1d4   : > { %v1255_v10 = vadd.f32 %v1254_v30, %v1224_v34  ;;  %v1369_v55 = vadd.f32 %v1368_v31, %v1313_v9 }
 0x1d6   : > { %v1258_v14 = vadd.f32 %v1255_v10, %v995_v11 }
 0x1d9   : > { %v1402_v50 = vpop.f32.mrf.mxu0  ;;  %v1481_v60 = vpop.f32.mrf.mxu2 }
 0x1da   : > { %v1403_v42 = vadd.f32 %v1402_v50, %v1365_v2  ;;  %v1442_v0 = vpop.f32.mrf.mxu1 }
 0x1db   : > { %v1512_v22 = vpop.f32.mrf.mxu3 }
 0x1dc   : > { %v1437_v1 = vadd.f32 %v1436_v15, %v1403_v42 }
 0x1de   : > { %v1482_v5 = vadd.f32 %v1481_v60, %v1437_v1 }
 0x1e0   : > { %v1513_v8 = vadd.f32 %v1512_v22, %v1482_v5 }
 0x1e1   : > { %v1407_v26 = vpop.f32.mrf.mxu0  ;;  %v1485_v38 = vpop.f32.mrf.mxu2 }
 0x1e2   : > { %v3650_v24 = vadd.f32 %v1513_v8, %v1257_v4  ;;  %v1408_v53 = vadd.f32 %v1407_v26, %v1369_v55  ;;  %v1626_v23 = vpop.f32.mrf.mxu1 }
 0x1e3   : > { %v1516_v54 = vpop.f32.mrf.mxu3 }
 0x1e4   : > { %v1443_v35 = vadd.f32 %v1442_v0, %v1408_v53 }
 0x1e6   : > { %v1486_v45 = vadd.f32 %v1485_v38, %v1443_v35 }
 0x1e8   : > { %v1517_v32 = vadd.f32 %v1516_v54, %v1486_v45 }
 0x1e9   : > { %v1567_v39 = vpop.f32.mrf.mxu0  ;;  %v1664_v12 = vpop.f32.mrf.mxu2 }
 0x1ea   : > { %v1520_v33 = vadd.f32 %v1517_v32, %v1258_v14  ;;  %v1630_v19 = vpop.f32.mrf.mxu1  ;;  %v1627_v62 = vadd.f32 %v1626_v23, %v1567_v39 }
 0x1eb   : > { %v1698_v63 = vpop.f32.mrf.mxu3 }
 0x1ec   : > { %v1665_v6 = vadd.f32 %v1664_v12, %v1627_v62 }
 0x1ee   : > { %v1699_v46 = vadd.f32 %v1698_v63, %v1665_v6 }
 0x1f1   : > { %v1575_v58 = vpop.f32.mrf.mxu0  ;;  %v1669_v49 = vpop.f32.mrf.mxu2 }
 0x1f2   : > { %v1774_v20 = vpop.f32.mrf.mxu1  ;;  %v1631_v27 = vadd.f32 %v1630_v19, %v1575_v58 }
 0x1f3   : > { %v1704_v61 = vpop.f32.mrf.mxu3 }
 0x1f4   : > { %v1670_v29 = vadd.f32 %v1669_v49, %v1631_v27 }
 0x1f6   : > { %v1705_v2 = vadd.f32 %v1704_v61, %v1670_v29 }
 0x1f9   : > { %v1743_v16 = vpop.f32.mrf.mxu0  ;;  %v1829_v13 = vpop.f32.mrf.mxu2 }
 0x1fa   : > { %v1778_v21 = vpop.f32.mrf.mxu1  ;;  %v1744_v10 = vadd.f32 %v1743_v16, %v1699_v46 }
 0x1fb   : > { %v1888_v3 = vpop.f32.mrf.mxu3 }
 0x1fc   : > { %v1889_v18 = vadd.f32 %v1888_v3, %v1829_v13  ;;  %v1775_v1 = vadd.f32 %v1774_v20, %v1744_v10  ;;  %v2308_v20 = vstv %s2307_s20 }
 0x1fe   : > { %v1781_v35 = vadd.f32 %v1775_v1, %v3650_v24 }
 0x201   : > { %v1747_v40 = vpop.f32.mrf.mxu0  ;;  %v1837_v25 = vpop.f32.mrf.mxu2 }
 0x202   : > { %v1960_v36 = vpop.f32.mrf.mxu1  ;;  %v1748_v55 = vadd.f32 %v1747_v40, %v1705_v2 }
 0x203   : > { %v1892_v11 = vpop.f32.mrf.mxu3 }
 0x204   : > { %v1893_v51 = vadd.f32 %v1892_v11, %v1837_v25  ;;  %v1779_v5 = vadd.f32 %v1778_v21, %v1748_v55 }
 0x206   : > { %v1782_v45 = vadd.f32 %v1779_v5, %v1520_v33 }
 0x209   : > { %v1926_v59 = vpop.f32.mrf.mxu0  ;;  %v2005_v44 = vpop.f32.mrf.mxu2 }
 0x20a   : > { %v1966_v7 = vpop.f32.mrf.mxu1  ;;  %v1927_v30 = vadd.f32 %v1926_v59, %v1889_v18 }
 0x20b   : > { %v2036_v47 = vpop.f32.mrf.mxu3 }
 0x20c   : > { %v1961_v4 = vadd.f32 %v1960_v36, %v1927_v30 }
 0x20e   : > { %v2006_v60 = vadd.f32 %v2005_v44, %v1961_v4 }
 0x210   : > { %v2037_v8 = vadd.f32 %v2036_v47, %v2006_v60 }
 0x211   : > { %v1931_v17 = vpop.f32.mrf.mxu0  ;;  %v2009_v37 = vpop.f32.mrf.mxu2 }
 0x212   : > { %v2150_v57 = vpop.f32.mrf.mxu1  ;;  %v1932_v56 = vadd.f32 %v1931_v17, %v1893_v51  ;;  %v2043_v63 = vadd.f32 %v2037_v8, %v1781_v35 }
 0x213   : > { %v2040_v43 = vpop.f32.mrf.mxu3 }
 0x214   : > { %v1967_v28 = vadd.f32 %v1966_v7, %v1932_v56 }
 0x216   : > { %v2010_v42 = vadd.f32 %v2009_v37, %v1967_v28 }
 0x218   : > { %v2041_v26 = vadd.f32 %v2040_v43, %v2010_v42 }
 0x219   : > { %v2091_v41 = vpop.f32.mrf.mxu0  ;;  %v2188_v52 = vpop.f32.mrf.mxu2 }
 0x21a   : > { %v2151_v9 = vadd.f32 %v2150_v57, %v2091_v41  ;;  %v2154_v34 = vpop.f32.mrf.mxu1  ;;  %v2044_v58 = vadd.f32 %v2041_v26, %v1782_v45 }
 0x21b   : > { %v2222_v48 = vpop.f32.mrf.mxu3 }
 0x21c   : > { %v2189_v0 = vadd.f32 %v2188_v52, %v2151_v9 }
 0x21e   : > { %v2223_v38 = vadd.f32 %v2222_v48, %v2189_v0 }
 0x221   : > { %v2099_v15 = vpop.f32.mrf.mxu0  ;;  %v2193_v31 = vpop.f32.mrf.mxu2 }
 0x222   : > { %v2155_v14 = vadd.f32 %v2154_v34, %v2099_v15  ;;  %v2298_v12 = vpop.f32.mrf.mxu1 }
 0x223   : > { %v2228_v50 = vpop.f32.mrf.mxu3 }
 0x224   : > { %v2194_v22 = vadd.f32 %v2193_v31, %v2155_v14 }
 0x226   : > { %v2229_v53 = vadd.f32 %v2228_v50, %v2194_v22 }
 0x229   : > { %v2267_v23 = vpop.f32.mrf.mxu0  ;;  %v2271_v54 = vpop.f32.mrf.mxu2 }
 0x22a   : > { %v2268_v32 = vadd.f32 %v2267_v23, %v2223_v38  ;;  %v2272_v39 = vadd.f32 %v2271_v54, %v2229_v53 }
 0x22b   : > { %v2302_v19 = vpop.f32.mrf.mxu3 }
 0x22c   : > { %v2299_v49 = vadd.f32 %v2298_v12, %v2268_v32  ;;  %v2303_v61 = vadd.f32 %v2302_v19, %v2272_v39 }
 0x22e   : > { %v2305_v16 = vadd.f32 %v2299_v49, %v2043_v63  ;;  %v2306_v13 = vadd.f32 %v2303_v61, %v2044_v58 }
 0x230   : > { %v2309_v21 = vadd.f32 %v2308_v20, %v2305_v16  ;;  %v2310_v3 = vadd.f32 %v2308_v20, %v2306_v13 }
 0x232   : > { %v2491_v40 = vmul.f32 -1.442695, %v2309_v21  ;;  %v2492_v25 = vmul.f32 -1.442695, %v2310_v3 }
 0x234   : > { %2587 = vpow2.f32 %v2491_v40 }
 0x235   : > { %2589 = vpow2.f32 %v2492_v25 }
 0x23a   : > { %v2588_v24 = vpop.eup %2587 }
 0x23b   : > { %v2590_v33 = vpop.eup %2589  ;;  %v2317_v36 = vadd.f32 1.0, %v2588_v24 }
 0x23c   : > { %v2318_v11 = vadd.f32 1.0, %v2590_v33 }
 0x23d   : > { %2591 = vrcp.f32 %v2317_v36  ;;  %v2330_v43 = vand.u32 2147483648, %v2317_v36  ;;  %v2328_v62 = vand.u32 2147483647, %v2317_v36  ;;  %vm2324_vm9 = vweird.f32 %v2317_v36 }
 0x23e   : > { %2593 = vrcp.f32 %v2318_v11  ;;  %v2345_v27 = vand.u32 2147483648, %v2318_v11  ;;  %v2343_v52 = vand.u32 2147483647, %v2318_v11  ;;  %vm2339_vm11 = vweird.f32 %v2318_v11 }
 0x23f   : > { %v2331_v51 = vor.u32 1.1754944e-38, %v2330_v43  ;;  %vm2329_vm13 = vcmp.eq.f32.partialorder %v2328_v62, 8.507059e+37 }
 0x240   : > { %v2346_v29 = vor.u32 1.1754944e-38, %v2345_v27  ;;  %vm2344_vm15 = vcmp.eq.f32.partialorder %v2343_v52, 8.507059e+37 }
 0x243   : > { %v2592_v59 = vpop.eup %2591 }
 0x244   : > { %v2594_v44 = vpop.eup %2593  ;;  %v2320_v47 = vmul.f32 %v2592_v59, %v2317_v36  ;;  %vm2325_vm7 = vweird.f32 %v2592_v59 }
 0x245   : > { %v2335_v7 = vmul.f32 %v2594_v44, %v2318_v11  ;;  %vm2340_vm8 = vweird.f32 %v2594_v44  ;;  %vm2326_vm10 = vmor %vm2324_vm9, %vm2325_vm7 }
 0x246   : > { %v2321_v17 = vsub.f32 1.0, %v2320_v47  ;;  %vm2341_vm14 = vmor %vm2339_vm11, %vm2340_vm8 }
 0x247   : > { %v2336_v37 = vsub.f32 1.0, %v2335_v7 }
 0x248   : > { %v2322_v57 = vmul.f32 %v2592_v59, %v2321_v17 }
 0x249   : > { %v2337_v41 = vmul.f32 %v2594_v44, %v2336_v37 }
 0x24a   : > { %v2323_v18 = vadd.f32 %v2592_v59, %v2322_v57 }
 0x24b   : > { %v2338_v6 = vadd.f32 %v2594_v44, %v2337_v41 }
 0x24c   : > { %v2327_v48 = vsel %vm2326_vm10, %v2592_v59, %v2323_v18 }
 0x24d   : > { %v2332_v30 = vsel %vm2329_vm13, %v2331_v51, %v2327_v48  ;;  %v2342_v56 = vsel %vm2341_vm14, %v2594_v44, %v2338_v6 }
 0x24e   : > { %v2347_v46 = vsel %vm2344_vm15, %v2346_v29, %v2342_v56  ;;  %2350 = vst.msk [vmem:[%s186_s4] sm:$0xff] %vm2349_vm12, %v2332_v30 }
 0x24f   : > { %2351 = vst.msk [vmem:[%s186_s4 + $0x8] sm:$0xff] %vm2349_vm12, %v2347_v46 }
 0x250   : > { %2622 = shalt.err (!%p2619_p5)
}
 0x251   : > { %s2693_s1 = smov 128   ;;  %s2694_s20 = smov 8  }
 0x252   : > { %2512 = dma.vmem_to_hbm [thread:$0]  (%p2758_p4), %s2366_s5, 256, %s2368_s17, %s2353_s6, %s2693_s1, %s2693_s1, %s2694_s20  }
 0x253 PF: > { %p2518_p6 = scmp.ge.s32.totalorder %s2673_s19, 2  ;;  %s2382_s22 = sand.u32 1, %s2653_s14  }
 0x254   : > { %s2383_s24 = scalar_lea.sflag [#allocation7], %s2382_s22 }
 0x255   : > { %p2515_p7 = pnand %p2518_p6, %p2765_p8 }
 0x257   : > { %p2516_p9 = pneg %p2515_p7 }
 0x259   : > { %2648 = dma.done.wait (%p2516_p9), %s2383_s24, 256  }
 0x25a   : > { %2650 = vsyncadd (%p2516_p9), %s2383_s24, 4294967040  ;;  %s17_s19 = sadd.s32 1, %s2673_s19   ;;  %s3702_s14 = smov %s2657_s15 }
 0x25b   : > { %p14_p10 = scmp.ge.s32.totalorder %s17_s19, 4   ;;  %s3703_s15 = smov %s2661_s16 }
 0x25c   : > { %s3704_s16 = smov %s2771_s26  ;;  %s3705_s17 = smov %s2669_s18 }
 0x25d   : > { %s3706_s18 = smov %s3708_s21  ;;  %16 = sbr.rel (!%p14_p10) target bundleno = 6 (0x6), region = 81 }
 0x262   :  { %2389 = vsyncpa [#allocation7], 1 }
 0x263   :  { %2391 = vsyncpa [#allocation7 + $0x1], 1 }

</bundles_post_ra>
